<compile_context>
chip_gen: v6e
topology: v6e:2x2x1
jax: 0.10.0
libtpu: 0.0.40
codegen_flags: <defaults>
</compile_context>

<pallas_src>
import functools

import numpy as np
import jax
import jax.numpy as jnp
from jax import lax
from jax.experimental import pallas as pl
from jax.experimental.pallas import tpu as pltpu

# ---------------- synthetic Config ----------------
EMBED_SIZE = 32
NUM_ITEM = 50
MAX_TIME = 100
NUM_GENRE = 8            # config.num_side_info[0]
NUM_GENRE_PERIOD = 7
POP_HISTORY_LEN = 8
BETA = 0.3
IS_DOUBAN = False        # non-douban branch everywhere
A1, A2, A3, A4 = 0.1, 0.4, 0.3, 0.2

BATCH = 8
N_GENRE_SLOTS = 4


# ---------------- fused Pallas kernel ----------------
def fused_kernel(pop_ref, len_ref, bias_ref,          # SMEM inputs
                 xt_ref, g_ref, j_ref,                # VMEM inputs (B,3E),(B,G*E),(B,G*E)
                 wt_ref, ws_ref, wp_ref,              # VMEM weights (1,3E),(1,G*E),(1,G*E)
                 ph_ref, tsp_ref,                     # outputs: SMEM (B,), VMEM (B,3)
                 flat_ref,                            # SMEM scratch (B*L,)
                 *, beta):
    B = len_ref.shape[0]
    L = pop_ref.shape[0] // B

    # ---- ModulePopHistory.ema: static, fully-unrolled, branch-free scalar loop.
    # Faithfully keeps the original code's single ema_temp list shared across
    # rows (reads are flat[j-1] with the *within-row* index j).
    # Precondition (same as torch/numpy reference): valid_pop_len[i] >= 1.
    dump = jnp.int32(B * L - 1)          # scribble slot for masked-off writes (never read)
    pos = jnp.int32(0)
    for i in range(B):
        n = len_ref[i]
        last = jnp.float32(0.0)
        for j in range(L):
            v0 = pop_ref[i * L + j]
            if j == 0:
                v = v0
            else:
                v = beta * v0 + (1.0 - beta) * flat_ref[j - 1]
            active = j < n
            idx = jnp.where(active, pos, dump)
            flat_ref[idx] = v
            last = jnp.where(active, v, last)
            pos = pos + active.astype(jnp.int32)
        ph_ref[i] = last

    # ---- The three heads: one elementwise mul + one lane reduction each.
    # ModuleTime: weights pre-folded (td = trel - tim absorbed into weights).
    t_out = jnp.maximum(
        jnp.sum(xt_ref[...] * wt_ref[...], axis=1, keepdims=True) + bias_ref[0], 0.0)
    # ModuleSideInfo (non-douban): mean over G folded into tiled/scaled weight.
    s_out = jnp.maximum(
        jnp.sum(g_ref[...] * ws_ref[...], axis=1, keepdims=True) + bias_ref[1], 0.0)
    # ModulePeriodic: same trick.
    p_out = jnp.maximum(
        jnp.sum(j_ref[...] * wp_ref[...], axis=1, keepdims=True) + bias_ref[2], 0.0)

    # Pack [t, s, p] into one (B, 3) tile with a single store.
    col = lax.broadcasted_iota(jnp.int32, (B, 3), 1)
    tsp_ref[...] = jnp.where(col == 0, t_out, jnp.where(col == 1, s_out, p_out))


# ---------------- one-time parameter packing (offline weight folds) ----------------
def pack_params(params, n_genre_slots):
    E = EMBED_SIZE
    G = n_genre_slots
    wt = params['w_time']                                   # (1, 4E)
    w_a, w_b, w_c, w_d = wt[:, :E], wt[:, E:2 * E], wt[:, 2 * E:3 * E], wt[:, 3 * E:]
    # (trel - tim)@w_a + item@w_b + tim@w_c + trel@w_d
    #   == item@w_b + tim@(w_c - w_a) + trel@(w_d + w_a)
    w_time_eff = jnp.concatenate([w_b, w_c - w_a, w_d + w_a], axis=1)     # (1, 3E)
    w_side_tiled = jnp.tile(params['w_side'], (1, G)) * (1.0 / G)          # (1, G*E)
    w_per_tiled = jnp.tile(params['w_per'], (1, G)) * (1.0 / G)            # (1, G*E)
    bias3 = jnp.concatenate([params['b_time'][0], params['b_side'][0],
                             params['b_per'][0]]).astype(jnp.float32)      # (3,)
    return dict(embed_item=params['embed_item'], embed_time=params['embed_time'],
                embed_genre=params['embed_genre'], embed_joint=params['embed_joint'],
                w_time_eff=w_time_eff, w_side_tiled=w_side_tiled,
                w_per_tiled=w_per_tiled, bias3=bias3)


# ---------------- wrapper (gathers / index arithmetic are glue in plain JAX) ----------------
def pop_predict_forward(packed, item, time_release, item_genre, item_director,
                        item_actor, time, pop_history, pop_gt, valid_pop_len):
    del item_director, item_actor, pop_gt  # unused (is_douban=False; pop_gt unused in forward)
    B, G = item_genre.shape
    E = EMBED_SIZE

    # nn.Embedding lookups (gather glue)
    item_embed = packed['embed_item'][item]                  # (B, E)
    trel_embed = packed['embed_time'][time_release]          # (B, E)
    time_embed = packed['embed_time'][time]                  # (B, E)
    genre_embed = packed['embed_genre'][item_genre]          # (B, G, E)

    # ModulePeriodic index arithmetic
    period_time = jnp.broadcast_to((time % NUM_GENRE_PERIOD)[:, None], item_genre.shape)
    period_time_pad = jnp.minimum(item_genre, 1)             # torch.clamp(max=1)
    joint_id = (item_genre * NUM_GENRE_PERIOD + period_time) * period_time_pad
    joint_embed = packed['embed_joint'][joint_id]            # (B, G, E)

    # lane-dense inputs for the kernel
    xt = jnp.concatenate([item_embed, time_embed, trel_embed], axis=1)   # (B, 3E)
    genre_flat = genre_embed.reshape(B, G * E)                            # (B, G*E)
    joint_flat = joint_embed.reshape(B, G * E)                            # (B, G*E)

    smem = pl.BlockSpec(memory_space=pltpu.MemorySpace.SMEM)
    vmem = pl.BlockSpec(memory_space=pltpu.MemorySpace.VMEM)
    L = pop_history.shape[1]

    ph, tsp = pl.pallas_call(
        functools.partial(fused_kernel, beta=BETA),
        out_shape=(jax.ShapeDtypeStruct((B,), jnp.float32),
                   jax.ShapeDtypeStruct((B, 3), jnp.float32)),
        in_specs=[smem, smem, smem, vmem, vmem, vmem, vmem, vmem, vmem],
        out_specs=(smem, vmem),
        scratch_shapes=[pltpu.SMEM((B * L,), jnp.float32)],
    )(pop_history.astype(jnp.float32).reshape(-1),
      valid_pop_len.astype(jnp.int32),
      packed['bias3'],
      xt, genre_flat, joint_flat,
      packed['w_time_eff'], packed['w_side_tiled'], packed['w_per_tiled'])

    pop_history_output = ph[:, None]                         # (B, 1)
    time_out = tsp[:, 0:1]
    side_out = tsp[:, 1:2]
    per_out = tsp[:, 2:3]
    # attention weights [a1,a2,a3,a4] are zeroed at idx 0,2,3 in forward() and
    # divided by their sum (=a2), so the combine reduces exactly to the time head.
    output = tsp[:, 0]                                       # (B,) — F.linear w/ 1-D weight
    return pop_history_output, time_out, side_out, per_out, output


# ---------------- deterministic parameter init ----------------
def init_params(key):
    E = EMBED_SIZE
    ks = jax.random.split(key, 8)
    embed_item = jax.random.normal(ks[0], (NUM_ITEM, E), jnp.float32)
    embed_time = jax.random.normal(ks[1], (MAX_TIME + 1, E), jnp.float32)
    embed_genre = jax.random.normal(ks[2], (NUM_GENRE, E), jnp.float32).at[0].set(0.0)
    embed_joint = jax.random.normal(
        ks[3], (NUM_GENRE_PERIOD * NUM_GENRE, E), jnp.float32).at[0].set(0.0)
    # nn.Linear weights: normal(std=0.1), bias zero (per the init loop)
    w_time = 0.1 * jax.random.normal(ks[4], (1, 4 * E), jnp.float32)   # ModuleTime.fc_item_pop_value
    w_side = 0.1 * jax.random.normal(ks[5], (1, E), jnp.float32)       # ModuleSideInfo.fc_output
    w_per = 0.1 * jax.random.normal(ks[6], (1, E), jnp.float32)        # ModulePeriodic.fc_output
    zero_b = jnp.zeros((1, 1), jnp.float32)
    # TODO(synk): ModulePopHistory's LSTM / fc layers are dead code in forward() and are omitted.
    return dict(embed_item=embed_item, embed_time=embed_time, embed_genre=embed_genre,
                embed_joint=embed_joint, w_time=w_time, b_time=zero_b,
                w_side=w_side, b_side=zero_b, w_per=w_per, b_per=zero_b)


# ---------------- numpy reference (mirrors the torch code, incl. the ema quirk) ----------------
def reference_forward(p, item, time_release, item_genre, time, pop_history, valid_pop_len):
    item_embed = p['embed_item'][item]
    trel_embed = p['embed_time'][time_release]
    time_embed = p['embed_time'][time]
    genre_embed = p['embed_genre'][item_genre]

    ema_all, ema_temp = [], []
    for i in range(pop_history.shape[0]):
        line = pop_history[i]
        for j in range(int(valid_pop_len[i])):
            if j == 0:
                ema_temp.append(float(line[j]))
            else:
                ema_temp.append(BETA * float(line[j]) + (1 - BETA) * ema_temp[j - 1])
        ema_all.append(ema_temp[-1])
    ph_out = np.asarray(ema_all, np.float32)[:, None]

    cat4 = np.concatenate([trel_embed - time_embed, item_embed, time_embed, trel_embed], axis=1)
    t_out = np.maximum(cat4 @ p['w_time'].T + p['b_time'], 0.0)
    s_out = np.maximum(genre_embed.mean(axis=1) @ p['w_side'].T + p['b_side'], 0.0)

    period_time = (time % NUM_GENRE_PERIOD)[:, None] * np.ones_like(item_genre)
    pad = np.minimum(item_genre, 1)
    joint_id = (item_genre * NUM_GENRE_PERIOD + period_time) * pad
    p_out = np.maximum(p['embed_joint'][joint_id].mean(axis=1) @ p['w_per'].T + p['b_per'], 0.0)

    w = np.array([0.0, A2, 0.0, 0.0], np.float32)
    pred_all = np.concatenate([ph_out, t_out, s_out, p_out], axis=1)
    output = pred_all @ w / w.sum()
    return ph_out, t_out, s_out, p_out, output


if __name__ == "__main__":
    key = jax.random.PRNGKey(0)
    kp, ki = jax.random.split(key)
    params = init_params(kp)
    packed = pack_params(params, N_GENRE_SLOTS)   # one-time weight fold / tiling

    ks = jax.random.split(ki, 6)
    item = jax.random.randint(ks[0], (BATCH,), 0, NUM_ITEM, jnp.int32)
    time_release = jax.random.randint(ks[1], (BATCH,), 0, MAX_TIME + 1, jnp.int32)
    item_genre = jax.random.randint(ks[2], (BATCH, N_GENRE_SLOTS), 0, NUM_GENRE, jnp.int32)
    time = jax.random.randint(ks[3], (BATCH,), 0, MAX_TIME + 1, jnp.int32)
    pop_history = jax.random.uniform(ks[4], (BATCH, POP_HISTORY_LEN), jnp.float32)
    valid_pop_len = jax.random.randint(ks[5], (BATCH,), 1, POP_HISTORY_LEN + 1, jnp.int32)
    item_director = jnp.zeros((BATCH,), jnp.int32)
    item_actor = jnp.zeros((BATCH,), jnp.int32)
    pop_gt = jnp.zeros((BATCH,), jnp.float32)

    fwd = jax.jit(pop_predict_forward)
    outs = fwd(packed, item, time_release, item_genre, item_director, item_actor,
               time, pop_history, pop_gt, valid_pop_len)
    outs = jax.block_until_ready(outs)

    ref = reference_forward(
        {k: np.asarray(v) for k, v in params.items()},
        np.asarray(item), np.asarray(time_release), np.asarray(item_genre),
        np.asarray(time), np.asarray(pop_history), np.asarray(valid_pop_len))
    for got, want in zip(outs, ref):
        np.testing.assert_allclose(np.asarray(got), np.asarray(want, np.float32),
                                   rtol=1e-4, atol=1e-4)
    print("KERNEL_OK")
</pallas_src>

<mosaic_0001>
module attributes {stable_mosaic.version = 11 : i64} {
  func.func @fused_kernel(%arg0: memref<64xf32, #tpu.memory_space<smem>>, %arg1: memref<8xi32, #tpu.memory_space<smem>>, %arg2: memref<3xf32, #tpu.memory_space<smem>>, %arg3: memref<8x96xf32, #tpu.memory_space<vmem>>, %arg4: memref<8x128xf32, #tpu.memory_space<vmem>>, %arg5: memref<8x128xf32, #tpu.memory_space<vmem>>, %arg6: memref<1x96xf32, #tpu.memory_space<vmem>>, %arg7: memref<1x128xf32, #tpu.memory_space<vmem>>, %arg8: memref<1x128xf32, #tpu.memory_space<vmem>>, %arg9: memref<8xf32, #tpu.memory_space<smem>>, %arg10: memref<8x3xf32, #tpu.memory_space<vmem>>, %arg11: memref<64xf32, #tpu.memory_space<smem>>) attributes {dimension_semantics = [], scalar_prefetch = 0 : i64, scratch_operands = 1 : i64, tpu.core_type = #tpu.core_type<tc>} {
    %c0 = arith.constant 0 : index
    %0 = memref.load %arg1[%c0] : memref<8xi32, #tpu.memory_space<smem>>
    %c0_0 = arith.constant 0 : index
    %1 = memref.load %arg0[%c0_0] : memref<64xf32, #tpu.memory_space<smem>>
    %c0_i32 = arith.constant 0 : i32
    %2 = arith.cmpi sgt, %0, %c0_i32 : i32
    %c0_i32_1 = arith.constant 0 : i32
    %c63_i32 = arith.constant 63 : i32
    %3 = arith.select %2, %c0_i32_1, %c63_i32 : i32
    %4 = arith.index_cast %3 : i32 to index
    %5 = memref.load %arg11[%4] : memref<64xf32, #tpu.memory_space<smem>>
    memref.store %1, %arg11[%4] : memref<64xf32, #tpu.memory_space<smem>>
    %cst = arith.constant 0.000000e+00 : f32
    %6 = arith.select %2, %1, %cst : f32
    %7 = arith.extui %2 : i1 to i32
    %c0_i32_2 = arith.constant 0 : i32
    %8 = arith.addi %c0_i32_2, %7 : i32
    %c1 = arith.constant 1 : index
    %9 = memref.load %arg0[%c1] : memref<64xf32, #tpu.memory_space<smem>>
    %cst_3 = arith.constant 3.000000e-01 : f32
    %10 = arith.mulf %cst_3, %9 : f32
    %c0_4 = arith.constant 0 : index
    %11 = memref.load %arg11[%c0_4] : memref<64xf32, #tpu.memory_space<smem>>
    %cst_5 = arith.constant 0.699999988 : f32
    %12 = arith.mulf %cst_5, %11 : f32
    %13 = arith.addf %10, %12 : f32
    %c1_i32 = arith.constant 1 : i32
    %14 = arith.cmpi sgt, %0, %c1_i32 : i32
    %c63_i32_6 = arith.constant 63 : i32
    %15 = arith.select %14, %8, %c63_i32_6 : i32
    %16 = arith.index_cast %15 : i32 to index
    %17 = memref.load %arg11[%16] : memref<64xf32, #tpu.memory_space<smem>>
    memref.store %13, %arg11[%16] : memref<64xf32, #tpu.memory_space<smem>>
    %18 = arith.select %14, %13, %6 : f32
    %19 = arith.extui %14 : i1 to i32
    %20 = arith.addi %8, %19 : i32
    %c2 = arith.constant 2 : index
    %21 = memref.load %arg0[%c2] : memref<64xf32, #tpu.memory_space<smem>>
    %cst_7 = arith.constant 3.000000e-01 : f32
    %22 = arith.mulf %cst_7, %21 : f32
    %c1_8 = arith.constant 1 : index
    %23 = memref.load %arg11[%c1_8] : memref<64xf32, #tpu.memory_space<smem>>
    %cst_9 = arith.constant 0.699999988 : f32
    %24 = arith.mulf %cst_9, %23 : f32
    %25 = arith.addf %22, %24 : f32
    %c2_i32 = arith.constant 2 : i32
    %26 = arith.cmpi sgt, %0, %c2_i32 : i32
    %c63_i32_10 = arith.constant 63 : i32
    %27 = arith.select %26, %20, %c63_i32_10 : i32
    %28 = arith.index_cast %27 : i32 to index
    %29 = memref.load %arg11[%28] : memref<64xf32, #tpu.memory_space<smem>>
    memref.store %25, %arg11[%28] : memref<64xf32, #tpu.memory_space<smem>>
    %30 = arith.select %26, %25, %18 : f32
    %31 = arith.extui %26 : i1 to i32
    %32 = arith.addi %20, %31 : i32
    %c3 = arith.constant 3 : index
    %33 = memref.load %arg0[%c3] : memref<64xf32, #tpu.memory_space<smem>>
    %cst_11 = arith.constant 3.000000e-01 : f32
    %34 = arith.mulf %cst_11, %33 : f32
    %c2_12 = arith.constant 2 : index
    %35 = memref.load %arg11[%c2_12] : memref<64xf32, #tpu.memory_space<smem>>
    %cst_13 = arith.constant 0.699999988 : f32
    %36 = arith.mulf %cst_13, %35 : f32
    %37 = arith.addf %34, %36 : f32
    %c3_i32 = arith.constant 3 : i32
    %38 = arith.cmpi sgt, %0, %c3_i32 : i32
    %c63_i32_14 = arith.constant 63 : i32
    %39 = arith.select %38, %32, %c63_i32_14 : i32
    %40 = arith.index_cast %39 : i32 to index
    %41 = memref.load %arg11[%40] : memref<64xf32, #tpu.memory_space<smem>>
    memref.store %37, %arg11[%40] : memref<64xf32, #tpu.memory_space<smem>>
    %42 = arith.select %38, %37, %30 : f32
    %43 = arith.extui %38 : i1 to i32
    %44 = arith.addi %32, %43 : i32
    %c4 = arith.constant 4 : index
    %45 = memref.load %arg0[%c4] : memref<64xf32, #tpu.memory_space<smem>>
    %cst_15 = arith.constant 3.000000e-01 : f32
    %46 = arith.mulf %cst_15, %45 : f32
    %c3_16 = arith.constant 3 : index
    %47 = memref.load %arg11[%c3_16] : memref<64xf32, #tpu.memory_space<smem>>
    %cst_17 = arith.constant 0.699999988 : f32
    %48 = arith.mulf %cst_17, %47 : f32
    %49 = arith.addf %46, %48 : f32
    %c4_i32 = arith.constant 4 : i32
    %50 = arith.cmpi sgt, %0, %c4_i32 : i32
    %c63_i32_18 = arith.constant 63 : i32
    %51 = arith.select %50, %44, %c63_i32_18 : i32
    %52 = arith.index_cast %51 : i32 to index
    %53 = memref.load %arg11[%52] : memref<64xf32, #tpu.memory_space<smem>>
    memref.store %49, %arg11[%52] : memref<64xf32, #tpu.memory_space<smem>>
    %54 = arith.select %50, %49, %42 : f32
    %55 = arith.extui %50 : i1 to i32
    %56 = arith.addi %44, %55 : i32
    %c5 = arith.constant 5 : index
    %57 = memref.load %arg0[%c5] : memref<64xf32, #tpu.memory_space<smem>>
    %cst_19 = arith.constant 3.000000e-01 : f32
    %58 = arith.mulf %cst_19, %57 : f32
    %c4_20 = arith.constant 4 : index
    %59 = memref.load %arg11[%c4_20] : memref<64xf32, #tpu.memory_space<smem>>
    %cst_21 = arith.constant 0.699999988 : f32
    %60 = arith.mulf %cst_21, %59 : f32
    %61 = arith.addf %58, %60 : f32
    %c5_i32 = arith.constant 5 : i32
    %62 = arith.cmpi sgt, %0, %c5_i32 : i32
    %c63_i32_22 = arith.constant 63 : i32
    %63 = arith.select %62, %56, %c63_i32_22 : i32
    %64 = arith.index_cast %63 : i32 to index
    %65 = memref.load %arg11[%64] : memref<64xf32, #tpu.memory_space<smem>>
    memref.store %61, %arg11[%64] : memref<64xf32, #tpu.memory_space<smem>>
    %66 = arith.select %62, %61, %54 : f32
    %67 = arith.extui %62 : i1 to i32
    %68 = arith.addi %56, %67 : i32
    %c6 = arith.constant 6 : index
    %69 = memref.load %arg0[%c6] : memref<64xf32, #tpu.memory_space<smem>>
    %cst_23 = arith.constant 3.000000e-01 : f32
    %70 = arith.mulf %cst_23, %69 : f32
    %c5_24 = arith.constant 5 : index
    %71 = memref.load %arg11[%c5_24] : memref<64xf32, #tpu.memory_space<smem>>
    %cst_25 = arith.constant 0.699999988 : f32
    %72 = arith.mulf %cst_25, %71 : f32
    %73 = arith.addf %70, %72 : f32
    %c6_i32 = arith.constant 6 : i32
    %74 = arith.cmpi sgt, %0, %c6_i32 : i32
    %c63_i32_26 = arith.constant 63 : i32
    %75 = arith.select %74, %68, %c63_i32_26 : i32
    %76 = arith.index_cast %75 : i32 to index
    %77 = memref.load %arg11[%76] : memref<64xf32, #tpu.memory_space<smem>>
    memref.store %73, %arg11[%76] : memref<64xf32, #tpu.memory_space<smem>>
    %78 = arith.select %74, %73, %66 : f32
    %79 = arith.extui %74 : i1 to i32
    %80 = arith.addi %68, %79 : i32
    %c7 = arith.constant 7 : index
    %81 = memref.load %arg0[%c7] : memref<64xf32, #tpu.memory_space<smem>>
    %cst_27 = arith.constant 3.000000e-01 : f32
    %82 = arith.mulf %cst_27, %81 : f32
    %c6_28 = arith.constant 6 : index
    %83 = memref.load %arg11[%c6_28] : memref<64xf32, #tpu.memory_space<smem>>
    %cst_29 = arith.constant 0.699999988 : f32
    %84 = arith.mulf %cst_29, %83 : f32
    %85 = arith.addf %82, %84 : f32
    %c7_i32 = arith.constant 7 : i32
    %86 = arith.cmpi sgt, %0, %c7_i32 : i32
    %c63_i32_30 = arith.constant 63 : i32
    %87 = arith.select %86, %80, %c63_i32_30 : i32
    %88 = arith.index_cast %87 : i32 to index
    %89 = memref.load %arg11[%88] : memref<64xf32, #tpu.memory_space<smem>>
    memref.store %85, %arg11[%88] : memref<64xf32, #tpu.memory_space<smem>>
    %90 = arith.select %86, %85, %78 : f32
    %91 = arith.extui %86 : i1 to i32
    %92 = arith.addi %80, %91 : i32
    %c0_31 = arith.constant 0 : index
    %93 = memref.load %arg9[%c0_31] : memref<8xf32, #tpu.memory_space<smem>>
    memref.store %90, %arg9[%c0_31] : memref<8xf32, #tpu.memory_space<smem>>
    %c1_32 = arith.constant 1 : index
    %94 = memref.load %arg1[%c1_32] : memref<8xi32, #tpu.memory_space<smem>>
    %c8 = arith.constant 8 : index
    %95 = memref.load %arg0[%c8] : memref<64xf32, #tpu.memory_space<smem>>
    %c0_i32_33 = arith.constant 0 : i32
    %96 = arith.cmpi sgt, %94, %c0_i32_33 : i32
    %c63_i32_34 = arith.constant 63 : i32
    %97 = arith.select %96, %92, %c63_i32_34 : i32
    %98 = arith.index_cast %97 : i32 to index
    %99 = memref.load %arg11[%98] : memref<64xf32, #tpu.memory_space<smem>>
    memref.store %95, %arg11[%98] : memref<64xf32, #tpu.memory_space<smem>>
    %cst_35 = arith.constant 0.000000e+00 : f32
    %100 = arith.select %96, %95, %cst_35 : f32
    %101 = arith.extui %96 : i1 to i32
    %102 = arith.addi %92, %101 : i32
    %c9 = arith.constant 9 : index
    %103 = memref.load %arg0[%c9] : memref<64xf32, #tpu.memory_space<smem>>
    %cst_36 = arith.constant 3.000000e-01 : f32
    %104 = arith.mulf %cst_36, %103 : f32
    %c0_37 = arith.constant 0 : index
    %105 = memref.load %arg11[%c0_37] : memref<64xf32, #tpu.memory_space<smem>>
    %cst_38 = arith.constant 0.699999988 : f32
    %106 = arith.mulf %cst_38, %105 : f32
    %107 = arith.addf %104, %106 : f32
    %c1_i32_39 = arith.constant 1 : i32
    %108 = arith.cmpi sgt, %94, %c1_i32_39 : i32
    %c63_i32_40 = arith.constant 63 : i32
    %109 = arith.select %108, %102, %c63_i32_40 : i32
    %110 = arith.index_cast %109 : i32 to index
    %111 = memref.load %arg11[%110] : memref<64xf32, #tpu.memory_space<smem>>
    memref.store %107, %arg11[%110] : memref<64xf32, #tpu.memory_space<smem>>
    %112 = arith.select %108, %107, %100 : f32
    %113 = arith.extui %108 : i1 to i32
    %114 = arith.addi %102, %113 : i32
    %c10 = arith.constant 10 : index
    %115 = memref.load %arg0[%c10] : memref<64xf32, #tpu.memory_space<smem>>
    %cst_41 = arith.constant 3.000000e-01 : f32
    %116 = arith.mulf %cst_41, %115 : f32
    %c1_42 = arith.constant 1 : index
    %117 = memref.load %arg11[%c1_42] : memref<64xf32, #tpu.memory_space<smem>>
    %cst_43 = arith.constant 0.699999988 : f32
    %118 = arith.mulf %cst_43, %117 : f32
    %119 = arith.addf %116, %118 : f32
    %c2_i32_44 = arith.constant 2 : i32
    %120 = arith.cmpi sgt, %94, %c2_i32_44 : i32
    %c63_i32_45 = arith.constant 63 : i32
    %121 = arith.select %120, %114, %c63_i32_45 : i32
    %122 = arith.index_cast %121 : i32 to index
    %123 = memref.load %arg11[%122] : memref<64xf32, #tpu.memory_space<smem>>
    memref.store %119, %arg11[%122] : memref<64xf32, #tpu.memory_space<smem>>
    %124 = arith.select %120, %119, %112 : f32
    %125 = arith.extui %120 : i1 to i32
    %126 = arith.addi %114, %125 : i32
    %c11 = arith.constant 11 : index
    %127 = memref.load %arg0[%c11] : memref<64xf32, #tpu.memory_space<smem>>
    %cst_46 = arith.constant 3.000000e-01 : f32
    %128 = arith.mulf %cst_46, %127 : f32
    %c2_47 = arith.constant 2 : index
    %129 = memref.load %arg11[%c2_47] : memref<64xf32, #tpu.memory_space<smem>>
    %cst_48 = arith.constant 0.699999988 : f32
    %130 = arith.mulf %cst_48, %129 : f32
    %131 = arith.addf %128, %130 : f32
    %c3_i32_49 = arith.constant 3 : i32
    %132 = arith.cmpi sgt, %94, %c3_i32_49 : i32
    %c63_i32_50 = arith.constant 63 : i32
    %133 = arith.select %132, %126, %c63_i32_50 : i32
    %134 = arith.index_cast %133 : i32 to index
    %135 = memref.load %arg11[%134] : memref<64xf32, #tpu.memory_space<smem>>
    memref.store %131, %arg11[%134] : memref<64xf32, #tpu.memory_space<smem>>
    %136 = arith.select %132, %131, %124 : f32
    %137 = arith.extui %132 : i1 to i32
    %138 = arith.addi %126, %137 : i32
    %c12 = arith.constant 12 : index
    %139 = memref.load %arg0[%c12] : memref<64xf32, #tpu.memory_space<smem>>
    %cst_51 = arith.constant 3.000000e-01 : f32
    %140 = arith.mulf %cst_51, %139 : f32
    %c3_52 = arith.constant 3 : index
    %141 = memref.load %arg11[%c3_52] : memref<64xf32, #tpu.memory_space<smem>>
    %cst_53 = arith.constant 0.699999988 : f32
    %142 = arith.mulf %cst_53, %141 : f32
    %143 = arith.addf %140, %142 : f32
    %c4_i32_54 = arith.constant 4 : i32
    %144 = arith.cmpi sgt, %94, %c4_i32_54 : i32
    %c63_i32_55 = arith.constant 63 : i32
    %145 = arith.select %144, %138, %c63_i32_55 : i32
    %146 = arith.index_cast %145 : i32 to index
    %147 = memref.load %arg11[%146] : memref<64xf32, #tpu.memory_space<smem>>
    memref.store %143, %arg11[%146] : memref<64xf32, #tpu.memory_space<smem>>
    %148 = arith.select %144, %143, %136 : f32
    %149 = arith.extui %144 : i1 to i32
    %150 = arith.addi %138, %149 : i32
    %c13 = arith.constant 13 : index
    %151 = memref.load %arg0[%c13] : memref<64xf32, #tpu.memory_space<smem>>
    %cst_56 = arith.constant 3.000000e-01 : f32
    %152 = arith.mulf %cst_56, %151 : f32
    %c4_57 = arith.constant 4 : index
    %153 = memref.load %arg11[%c4_57] : memref<64xf32, #tpu.memory_space<smem>>
    %cst_58 = arith.constant 0.699999988 : f32
    %154 = arith.mulf %cst_58, %153 : f32
    %155 = arith.addf %152, %154 : f32
    %c5_i32_59 = arith.constant 5 : i32
    %156 = arith.cmpi sgt, %94, %c5_i32_59 : i32
    %c63_i32_60 = arith.constant 63 : i32
    %157 = arith.select %156, %150, %c63_i32_60 : i32
    %158 = arith.index_cast %157 : i32 to index
    %159 = memref.load %arg11[%158] : memref<64xf32, #tpu.memory_space<smem>>
    memref.store %155, %arg11[%158] : memref<64xf32, #tpu.memory_space<smem>>
    %160 = arith.select %156, %155, %148 : f32
    %161 = arith.extui %156 : i1 to i32
    %162 = arith.addi %150, %161 : i32
    %c14 = arith.constant 14 : index
    %163 = memref.load %arg0[%c14] : memref<64xf32, #tpu.memory_space<smem>>
    %cst_61 = arith.constant 3.000000e-01 : f32
    %164 = arith.mulf %cst_61, %163 : f32
    %c5_62 = arith.constant 5 : index
    %165 = memref.load %arg11[%c5_62] : memref<64xf32, #tpu.memory_space<smem>>
    %cst_63 = arith.constant 0.699999988 : f32
    %166 = arith.mulf %cst_63, %165 : f32
    %167 = arith.addf %164, %166 : f32
    %c6_i32_64 = arith.constant 6 : i32
    %168 = arith.cmpi sgt, %94, %c6_i32_64 : i32
    %c63_i32_65 = arith.constant 63 : i32
    %169 = arith.select %168, %162, %c63_i32_65 : i32
    %170 = arith.index_cast %169 : i32 to index
    %171 = memref.load %arg11[%170] : memref<64xf32, #tpu.memory_space<smem>>
    memref.store %167, %arg11[%170] : memref<64xf32, #tpu.memory_space<smem>>
    %172 = arith.select %168, %167, %160 : f32
    %173 = arith.extui %168 : i1 to i32
    %174 = arith.addi %162, %173 : i32
    %c15 = arith.constant 15 : index
    %175 = memref.load %arg0[%c15] : memref<64xf32, #tpu.memory_space<smem>>
    %cst_66 = arith.constant 3.000000e-01 : f32
    %176 = arith.mulf %cst_66, %175 : f32
    %c6_67 = arith.constant 6 : index
    %177 = memref.load %arg11[%c6_67] : memref<64xf32, #tpu.memory_space<smem>>
    %cst_68 = arith.constant 0.699999988 : f32
    %178 = arith.mulf %cst_68, %177 : f32
    %179 = arith.addf %176, %178 : f32
    %c7_i32_69 = arith.constant 7 : i32
    %180 = arith.cmpi sgt, %94, %c7_i32_69 : i32
    %c63_i32_70 = arith.constant 63 : i32
    %181 = arith.select %180, %174, %c63_i32_70 : i32
    %182 = arith.index_cast %181 : i32 to index
    %183 = memref.load %arg11[%182] : memref<64xf32, #tpu.memory_space<smem>>
    memref.store %179, %arg11[%182] : memref<64xf32, #tpu.memory_space<smem>>
    %184 = arith.select %180, %179, %172 : f32
    %185 = arith.extui %180 : i1 to i32
    %186 = arith.addi %174, %185 : i32
    %c1_71 = arith.constant 1 : index
    %187 = memref.load %arg9[%c1_71] : memref<8xf32, #tpu.memory_space<smem>>
    memref.store %184, %arg9[%c1_71] : memref<8xf32, #tpu.memory_space<smem>>
    %c2_72 = arith.constant 2 : index
    %188 = memref.load %arg1[%c2_72] : memref<8xi32, #tpu.memory_space<smem>>
    %c16 = arith.constant 16 : index
    %189 = memref.load %arg0[%c16] : memref<64xf32, #tpu.memory_space<smem>>
    %c0_i32_73 = arith.constant 0 : i32
    %190 = arith.cmpi sgt, %188, %c0_i32_73 : i32
    %c63_i32_74 = arith.constant 63 : i32
    %191 = arith.select %190, %186, %c63_i32_74 : i32
    %192 = arith.index_cast %191 : i32 to index
    %193 = memref.load %arg11[%192] : memref<64xf32, #tpu.memory_space<smem>>
    memref.store %189, %arg11[%192] : memref<64xf32, #tpu.memory_space<smem>>
    %cst_75 = arith.constant 0.000000e+00 : f32
    %194 = arith.select %190, %189, %cst_75 : f32
    %195 = arith.extui %190 : i1 to i32
    %196 = arith.addi %186, %195 : i32
    %c17 = arith.constant 17 : index
    %197 = memref.load %arg0[%c17] : memref<64xf32, #tpu.memory_space<smem>>
    %cst_76 = arith.constant 3.000000e-01 : f32
    %198 = arith.mulf %cst_76, %197 : f32
    %c0_77 = arith.constant 0 : index
    %199 = memref.load %arg11[%c0_77] : memref<64xf32, #tpu.memory_space<smem>>
    %cst_78 = arith.constant 0.699999988 : f32
    %200 = arith.mulf %cst_78, %199 : f32
    %201 = arith.addf %198, %200 : f32
    %c1_i32_79 = arith.constant 1 : i32
    %202 = arith.cmpi sgt, %188, %c1_i32_79 : i32
    %c63_i32_80 = arith.constant 63 : i32
    %203 = arith.select %202, %196, %c63_i32_80 : i32
    %204 = arith.index_cast %203 : i32 to index
    %205 = memref.load %arg11[%204] : memref<64xf32, #tpu.memory_space<smem>>
    memref.store %201, %arg11[%204] : memref<64xf32, #tpu.memory_space<smem>>
    %206 = arith.select %202, %201, %194 : f32
    %207 = arith.extui %202 : i1 to i32
    %208 = arith.addi %196, %207 : i32
    %c18 = arith.constant 18 : index
    %209 = memref.load %arg0[%c18] : memref<64xf32, #tpu.memory_space<smem>>
    %cst_81 = arith.constant 3.000000e-01 : f32
    %210 = arith.mulf %cst_81, %209 : f32
    %c1_82 = arith.constant 1 : index
    %211 = memref.load %arg11[%c1_82] : memref<64xf32, #tpu.memory_space<smem>>
    %cst_83 = arith.constant 0.699999988 : f32
    %212 = arith.mulf %cst_83, %211 : f32
    %213 = arith.addf %210, %212 : f32
    %c2_i32_84 = arith.constant 2 : i32
    %214 = arith.cmpi sgt, %188, %c2_i32_84 : i32
    %c63_i32_85 = arith.constant 63 : i32
    %215 = arith.select %214, %208, %c63_i32_85 : i32
    %216 = arith.index_cast %215 : i32 to index
    %217 = memref.load %arg11[%216] : memref<64xf32, #tpu.memory_space<smem>>
    memref.store %213, %arg11[%216] : memref<64xf32, #tpu.memory_space<smem>>
    %218 = arith.select %214, %213, %206 : f32
    %219 = arith.extui %214 : i1 to i32
    %220 = arith.addi %208, %219 : i32
    %c19 = arith.constant 19 : index
    %221 = memref.load %arg0[%c19] : memref<64xf32, #tpu.memory_space<smem>>
    %cst_86 = arith.constant 3.000000e-01 : f32
    %222 = arith.mulf %cst_86, %221 : f32
    %c2_87 = arith.constant 2 : index
    %223 = memref.load %arg11[%c2_87] : memref<64xf32, #tpu.memory_space<smem>>
    %cst_88 = arith.constant 0.699999988 : f32
    %224 = arith.mulf %cst_88, %223 : f32
    %225 = arith.addf %222, %224 : f32
    %c3_i32_89 = arith.constant 3 : i32
    %226 = arith.cmpi sgt, %188, %c3_i32_89 : i32
    %c63_i32_90 = arith.constant 63 : i32
    %227 = arith.select %226, %220, %c63_i32_90 : i32
    %228 = arith.index_cast %227 : i32 to index
    %229 = memref.load %arg11[%228] : memref<64xf32, #tpu.memory_space<smem>>
    memref.store %225, %arg11[%228] : memref<64xf32, #tpu.memory_space<smem>>
    %230 = arith.select %226, %225, %218 : f32
    %231 = arith.extui %226 : i1 to i32
    %232 = arith.addi %220, %231 : i32
    %c20 = arith.constant 20 : index
    %233 = memref.load %arg0[%c20] : memref<64xf32, #tpu.memory_space<smem>>
    %cst_91 = arith.constant 3.000000e-01 : f32
    %234 = arith.mulf %cst_91, %233 : f32
    %c3_92 = arith.constant 3 : index
    %235 = memref.load %arg11[%c3_92] : memref<64xf32, #tpu.memory_space<smem>>
    %cst_93 = arith.constant 0.699999988 : f32
    %236 = arith.mulf %cst_93, %235 : f32
    %237 = arith.addf %234, %236 : f32
    %c4_i32_94 = arith.constant 4 : i32
    %238 = arith.cmpi sgt, %188, %c4_i32_94 : i32
    %c63_i32_95 = arith.constant 63 : i32
    %239 = arith.select %238, %232, %c63_i32_95 : i32
    %240 = arith.index_cast %239 : i32 to index
    %241 = memref.load %arg11[%240] : memref<64xf32, #tpu.memory_space<smem>>
    memref.store %237, %arg11[%240] : memref<64xf32, #tpu.memory_space<smem>>
    %242 = arith.select %238, %237, %230 : f32
    %243 = arith.extui %238 : i1 to i32
    %244 = arith.addi %232, %243 : i32
    %c21 = arith.constant 21 : index
    %245 = memref.load %arg0[%c21] : memref<64xf32, #tpu.memory_space<smem>>
    %cst_96 = arith.constant 3.000000e-01 : f32
    %246 = arith.mulf %cst_96, %245 : f32
    %c4_97 = arith.constant 4 : index
    %247 = memref.load %arg11[%c4_97] : memref<64xf32, #tpu.memory_space<smem>>
    %cst_98 = arith.constant 0.699999988 : f32
    %248 = arith.mulf %cst_98, %247 : f32
    %249 = arith.addf %246, %248 : f32
    %c5_i32_99 = arith.constant 5 : i32
    %250 = arith.cmpi sgt, %188, %c5_i32_99 : i32
    %c63_i32_100 = arith.constant 63 : i32
    %251 = arith.select %250, %244, %c63_i32_100 : i32
    %252 = arith.index_cast %251 : i32 to index
    %253 = memref.load %arg11[%252] : memref<64xf32, #tpu.memory_space<smem>>
    memref.store %249, %arg11[%252] : memref<64xf32, #tpu.memory_space<smem>>
    %254 = arith.select %250, %249, %242 : f32
    %255 = arith.extui %250 : i1 to i32
    %256 = arith.addi %244, %255 : i32
    %c22 = arith.constant 22 : index
    %257 = memref.load %arg0[%c22] : memref<64xf32, #tpu.memory_space<smem>>
    %cst_101 = arith.constant 3.000000e-01 : f32
    %258 = arith.mulf %cst_101, %257 : f32
    %c5_102 = arith.constant 5 : index
    %259 = memref.load %arg11[%c5_102] : memref<64xf32, #tpu.memory_space<smem>>
    %cst_103 = arith.constant 0.699999988 : f32
    %260 = arith.mulf %cst_103, %259 : f32
    %261 = arith.addf %258, %260 : f32
    %c6_i32_104 = arith.constant 6 : i32
    %262 = arith.cmpi sgt, %188, %c6_i32_104 : i32
    %c63_i32_105 = arith.constant 63 : i32
    %263 = arith.select %262, %256, %c63_i32_105 : i32
    %264 = arith.index_cast %263 : i32 to index
    %265 = memref.load %arg11[%264] : memref<64xf32, #tpu.memory_space<smem>>
    memref.store %261, %arg11[%264] : memref<64xf32, #tpu.memory_space<smem>>
    %266 = arith.select %262, %261, %254 : f32
    %267 = arith.extui %262 : i1 to i32
    %268 = arith.addi %256, %267 : i32
    %c23 = arith.constant 23 : index
    %269 = memref.load %arg0[%c23] : memref<64xf32, #tpu.memory_space<smem>>
    %cst_106 = arith.constant 3.000000e-01 : f32
    %270 = arith.mulf %cst_106, %269 : f32
    %c6_107 = arith.constant 6 : index
    %271 = memref.load %arg11[%c6_107] : memref<64xf32, #tpu.memory_space<smem>>
    %cst_108 = arith.constant 0.699999988 : f32
    %272 = arith.mulf %cst_108, %271 : f32
    %273 = arith.addf %270, %272 : f32
    %c7_i32_109 = arith.constant 7 : i32
    %274 = arith.cmpi sgt, %188, %c7_i32_109 : i32
    %c63_i32_110 = arith.constant 63 : i32
    %275 = arith.select %274, %268, %c63_i32_110 : i32
    %276 = arith.index_cast %275 : i32 to index
    %277 = memref.load %arg11[%276] : memref<64xf32, #tpu.memory_space<smem>>
    memref.store %273, %arg11[%276] : memref<64xf32, #tpu.memory_space<smem>>
    %278 = arith.select %274, %273, %266 : f32
    %279 = arith.extui %274 : i1 to i32
    %280 = arith.addi %268, %279 : i32
    %c2_111 = arith.constant 2 : index
    %281 = memref.load %arg9[%c2_111] : memref<8xf32, #tpu.memory_space<smem>>
    memref.store %278, %arg9[%c2_111] : memref<8xf32, #tpu.memory_space<smem>>
    %c3_112 = arith.constant 3 : index
    %282 = memref.load %arg1[%c3_112] : memref<8xi32, #tpu.memory_space<smem>>
    %c24 = arith.constant 24 : index
    %283 = memref.load %arg0[%c24] : memref<64xf32, #tpu.memory_space<smem>>
    %c0_i32_113 = arith.constant 0 : i32
    %284 = arith.cmpi sgt, %282, %c0_i32_113 : i32
    %c63_i32_114 = arith.constant 63 : i32
    %285 = arith.select %284, %280, %c63_i32_114 : i32
    %286 = arith.index_cast %285 : i32 to index
    %287 = memref.load %arg11[%286] : memref<64xf32, #tpu.memory_space<smem>>
    memref.store %283, %arg11[%286] : memref<64xf32, #tpu.memory_space<smem>>
    %cst_115 = arith.constant 0.000000e+00 : f32
    %288 = arith.select %284, %283, %cst_115 : f32
    %289 = arith.extui %284 : i1 to i32
    %290 = arith.addi %280, %289 : i32
    %c25 = arith.constant 25 : index
    %291 = memref.load %arg0[%c25] : memref<64xf32, #tpu.memory_space<smem>>
    %cst_116 = arith.constant 3.000000e-01 : f32
    %292 = arith.mulf %cst_116, %291 : f32
    %c0_117 = arith.constant 0 : index
    %293 = memref.load %arg11[%c0_117] : memref<64xf32, #tpu.memory_space<smem>>
    %cst_118 = arith.constant 0.699999988 : f32
    %294 = arith.mulf %cst_118, %293 : f32
    %295 = arith.addf %292, %294 : f32
    %c1_i32_119 = arith.constant 1 : i32
    %296 = arith.cmpi sgt, %282, %c1_i32_119 : i32
    %c63_i32_120 = arith.constant 63 : i32
    %297 = arith.select %296, %290, %c63_i32_120 : i32
    %298 = arith.index_cast %297 : i32 to index
    %299 = memref.load %arg11[%298] : memref<64xf32, #tpu.memory_space<smem>>
    memref.store %295, %arg11[%298] : memref<64xf32, #tpu.memory_space<smem>>
    %300 = arith.select %296, %295, %288 : f32
    %301 = arith.extui %296 : i1 to i32
    %302 = arith.addi %290, %301 : i32
    %c26 = arith.constant 26 : index
    %303 = memref.load %arg0[%c26] : memref<64xf32, #tpu.memory_space<smem>>
    %cst_121 = arith.constant 3.000000e-01 : f32
    %304 = arith.mulf %cst_121, %303 : f32
    %c1_122 = arith.constant 1 : index
    %305 = memref.load %arg11[%c1_122] : memref<64xf32, #tpu.memory_space<smem>>
    %cst_123 = arith.constant 0.699999988 : f32
    %306 = arith.mulf %cst_123, %305 : f32
    %307 = arith.addf %304, %306 : f32
    %c2_i32_124 = arith.constant 2 : i32
    %308 = arith.cmpi sgt, %282, %c2_i32_124 : i32
    %c63_i32_125 = arith.constant 63 : i32
    %309 = arith.select %308, %302, %c63_i32_125 : i32
    %310 = arith.index_cast %309 : i32 to index
    %311 = memref.load %arg11[%310] : memref<64xf32, #tpu.memory_space<smem>>
    memref.store %307, %arg11[%310] : memref<64xf32, #tpu.memory_space<smem>>
    %312 = arith.select %308, %307, %300 : f32
    %313 = arith.extui %308 : i1 to i32
    %314 = arith.addi %302, %313 : i32
    %c27 = arith.constant 27 : index
    %315 = memref.load %arg0[%c27] : memref<64xf32, #tpu.memory_space<smem>>
    %cst_126 = arith.constant 3.000000e-01 : f32
    %316 = arith.mulf %cst_126, %315 : f32
    %c2_127 = arith.constant 2 : index
    %317 = memref.load %arg11[%c2_127] : memref<64xf32, #tpu.memory_space<smem>>
    %cst_128 = arith.constant 0.699999988 : f32
    %318 = arith.mulf %cst_128, %317 : f32
    %319 = arith.addf %316, %318 : f32
    %c3_i32_129 = arith.constant 3 : i32
    %320 = arith.cmpi sgt, %282, %c3_i32_129 : i32
    %c63_i32_130 = arith.constant 63 : i32
    %321 = arith.select %320, %314, %c63_i32_130 : i32
    %322 = arith.index_cast %321 : i32 to index
    %323 = memref.load %arg11[%322] : memref<64xf32, #tpu.memory_space<smem>>
    memref.store %319, %arg11[%322] : memref<64xf32, #tpu.memory_space<smem>>
    %324 = arith.select %320, %319, %312 : f32
    %325 = arith.extui %320 : i1 to i32
    %326 = arith.addi %314, %325 : i32
    %c28 = arith.constant 28 : index
    %327 = memref.load %arg0[%c28] : memref<64xf32, #tpu.memory_space<smem>>
    %cst_131 = arith.constant 3.000000e-01 : f32
    %328 = arith.mulf %cst_131, %327 : f32
    %c3_132 = arith.constant 3 : index
    %329 = memref.load %arg11[%c3_132] : memref<64xf32, #tpu.memory_space<smem>>
    %cst_133 = arith.constant 0.699999988 : f32
    %330 = arith.mulf %cst_133, %329 : f32
    %331 = arith.addf %328, %330 : f32
    %c4_i32_134 = arith.constant 4 : i32
    %332 = arith.cmpi sgt, %282, %c4_i32_134 : i32
    %c63_i32_135 = arith.constant 63 : i32
    %333 = arith.select %332, %326, %c63_i32_135 : i32
    %334 = arith.index_cast %333 : i32 to index
    %335 = memref.load %arg11[%334] : memref<64xf32, #tpu.memory_space<smem>>
    memref.store %331, %arg11[%334] : memref<64xf32, #tpu.memory_space<smem>>
    %336 = arith.select %332, %331, %324 : f32
    %337 = arith.extui %332 : i1 to i32
    %338 = arith.addi %326, %337 : i32
    %c29 = arith.constant 29 : index
    %339 = memref.load %arg0[%c29] : memref<64xf32, #tpu.memory_space<smem>>
    %cst_136 = arith.constant 3.000000e-01 : f32
    %340 = arith.mulf %cst_136, %339 : f32
    %c4_137 = arith.constant 4 : index
    %341 = memref.load %arg11[%c4_137] : memref<64xf32, #tpu.memory_space<smem>>
    %cst_138 = arith.constant 0.699999988 : f32
    %342 = arith.mulf %cst_138, %341 : f32
    %343 = arith.addf %340, %342 : f32
    %c5_i32_139 = arith.constant 5 : i32
    %344 = arith.cmpi sgt, %282, %c5_i32_139 : i32
    %c63_i32_140 = arith.constant 63 : i32
    %345 = arith.select %344, %338, %c63_i32_140 : i32
    %346 = arith.index_cast %345 : i32 to index
    %347 = memref.load %arg11[%346] : memref<64xf32, #tpu.memory_space<smem>>
    memref.store %343, %arg11[%346] : memref<64xf32, #tpu.memory_space<smem>>
    %348 = arith.select %344, %343, %336 : f32
    %349 = arith.extui %344 : i1 to i32
    %350 = arith.addi %338, %349 : i32
    %c30 = arith.constant 30 : index
    %351 = memref.load %arg0[%c30] : memref<64xf32, #tpu.memory_space<smem>>
    %cst_141 = arith.constant 3.000000e-01 : f32
    %352 = arith.mulf %cst_141, %351 : f32
    %c5_142 = arith.constant 5 : index
    %353 = memref.load %arg11[%c5_142] : memref<64xf32, #tpu.memory_space<smem>>
    %cst_143 = arith.constant 0.699999988 : f32
    %354 = arith.mulf %cst_143, %353 : f32
    %355 = arith.addf %352, %354 : f32
    %c6_i32_144 = arith.constant 6 : i32
    %356 = arith.cmpi sgt, %282, %c6_i32_144 : i32
    %c63_i32_145 = arith.constant 63 : i32
    %357 = arith.select %356, %350, %c63_i32_145 : i32
    %358 = arith.index_cast %357 : i32 to index
    %359 = memref.load %arg11[%358] : memref<64xf32, #tpu.memory_space<smem>>
    memref.store %355, %arg11[%358] : memref<64xf32, #tpu.memory_space<smem>>
    %360 = arith.select %356, %355, %348 : f32
    %361 = arith.extui %356 : i1 to i32
    %362 = arith.addi %350, %361 : i32
    %c31 = arith.constant 31 : index
    %363 = memref.load %arg0[%c31] : memref<64xf32, #tpu.memory_space<smem>>
    %cst_146 = arith.constant 3.000000e-01 : f32
    %364 = arith.mulf %cst_146, %363 : f32
    %c6_147 = arith.constant 6 : index
    %365 = memref.load %arg11[%c6_147] : memref<64xf32, #tpu.memory_space<smem>>
    %cst_148 = arith.constant 0.699999988 : f32
    %366 = arith.mulf %cst_148, %365 : f32
    %367 = arith.addf %364, %366 : f32
    %c7_i32_149 = arith.constant 7 : i32
    %368 = arith.cmpi sgt, %282, %c7_i32_149 : i32
    %c63_i32_150 = arith.constant 63 : i32
    %369 = arith.select %368, %362, %c63_i32_150 : i32
    %370 = arith.index_cast %369 : i32 to index
    %371 = memref.load %arg11[%370] : memref<64xf32, #tpu.memory_space<smem>>
    memref.store %367, %arg11[%370] : memref<64xf32, #tpu.memory_space<smem>>
    %372 = arith.select %368, %367, %360 : f32
    %373 = arith.extui %368 : i1 to i32
    %374 = arith.addi %362, %373 : i32
    %c3_151 = arith.constant 3 : index
    %375 = memref.load %arg9[%c3_151] : memref<8xf32, #tpu.memory_space<smem>>
    memref.store %372, %arg9[%c3_151] : memref<8xf32, #tpu.memory_space<smem>>
    %c4_152 = arith.constant 4 : index
    %376 = memref.load %arg1[%c4_152] : memref<8xi32, #tpu.memory_space<smem>>
    %c32 = arith.constant 32 : index
    %377 = memref.load %arg0[%c32] : memref<64xf32, #tpu.memory_space<smem>>
    %c0_i32_153 = arith.constant 0 : i32
    %378 = arith.cmpi sgt, %376, %c0_i32_153 : i32
    %c63_i32_154 = arith.constant 63 : i32
    %379 = arith.select %378, %374, %c63_i32_154 : i32
    %380 = arith.index_cast %379 : i32 to index
    %381 = memref.load %arg11[%380] : memref<64xf32, #tpu.memory_space<smem>>
    memref.store %377, %arg11[%380] : memref<64xf32, #tpu.memory_space<smem>>
    %cst_155 = arith.constant 0.000000e+00 : f32
    %382 = arith.select %378, %377, %cst_155 : f32
    %383 = arith.extui %378 : i1 to i32
    %384 = arith.addi %374, %383 : i32
    %c33 = arith.constant 33 : index
    %385 = memref.load %arg0[%c33] : memref<64xf32, #tpu.memory_space<smem>>
    %cst_156 = arith.constant 3.000000e-01 : f32
    %386 = arith.mulf %cst_156, %385 : f32
    %c0_157 = arith.constant 0 : index
    %387 = memref.load %arg11[%c0_157] : memref<64xf32, #tpu.memory_space<smem>>
    %cst_158 = arith.constant 0.699999988 : f32
    %388 = arith.mulf %cst_158, %387 : f32
    %389 = arith.addf %386, %388 : f32
    %c1_i32_159 = arith.constant 1 : i32
    %390 = arith.cmpi sgt, %376, %c1_i32_159 : i32
    %c63_i32_160 = arith.constant 63 : i32
    %391 = arith.select %390, %384, %c63_i32_160 : i32
    %392 = arith.index_cast %391 : i32 to index
    %393 = memref.load %arg11[%392] : memref<64xf32, #tpu.memory_space<smem>>
    memref.store %389, %arg11[%392] : memref<64xf32, #tpu.memory_space<smem>>
    %394 = arith.select %390, %389, %382 : f32
    %395 = arith.extui %390 : i1 to i32
    %396 = arith.addi %384, %395 : i32
    %c34 = arith.constant 34 : index
    %397 = memref.load %arg0[%c34] : memref<64xf32, #tpu.memory_space<smem>>
    %cst_161 = arith.constant 3.000000e-01 : f32
    %398 = arith.mulf %cst_161, %397 : f32
    %c1_162 = arith.constant 1 : index
    %399 = memref.load %arg11[%c1_162] : memref<64xf32, #tpu.memory_space<smem>>
    %cst_163 = arith.constant 0.699999988 : f32
    %400 = arith.mulf %cst_163, %399 : f32
    %401 = arith.addf %398, %400 : f32
    %c2_i32_164 = arith.constant 2 : i32
    %402 = arith.cmpi sgt, %376, %c2_i32_164 : i32
    %c63_i32_165 = arith.constant 63 : i32
    %403 = arith.select %402, %396, %c63_i32_165 : i32
    %404 = arith.index_cast %403 : i32 to index
    %405 = memref.load %arg11[%404] : memref<64xf32, #tpu.memory_space<smem>>
    memref.store %401, %arg11[%404] : memref<64xf32, #tpu.memory_space<smem>>
    %406 = arith.select %402, %401, %394 : f32
    %407 = arith.extui %402 : i1 to i32
    %408 = arith.addi %396, %407 : i32
    %c35 = arith.constant 35 : index
    %409 = memref.load %arg0[%c35] : memref<64xf32, #tpu.memory_space<smem>>
    %cst_166 = arith.constant 3.000000e-01 : f32
    %410 = arith.mulf %cst_166, %409 : f32
    %c2_167 = arith.constant 2 : index
    %411 = memref.load %arg11[%c2_167] : memref<64xf32, #tpu.memory_space<smem>>
    %cst_168 = arith.constant 0.699999988 : f32
    %412 = arith.mulf %cst_168, %411 : f32
    %413 = arith.addf %410, %412 : f32
    %c3_i32_169 = arith.constant 3 : i32
    %414 = arith.cmpi sgt, %376, %c3_i32_169 : i32
    %c63_i32_170 = arith.constant 63 : i32
    %415 = arith.select %414, %408, %c63_i32_170 : i32
    %416 = arith.index_cast %415 : i32 to index
    %417 = memref.load %arg11[%416] : memref<64xf32, #tpu.memory_space<smem>>
    memref.store %413, %arg11[%416] : memref<64xf32, #tpu.memory_space<smem>>
    %418 = arith.select %414, %413, %406 : f32
    %419 = arith.extui %414 : i1 to i32
    %420 = arith.addi %408, %419 : i32
    %c36 = arith.constant 36 : index
    %421 = memref.load %arg0[%c36] : memref<64xf32, #tpu.memory_space<smem>>
    %cst_171 = arith.constant 3.000000e-01 : f32
    %422 = arith.mulf %cst_171, %421 : f32
    %c3_172 = arith.constant 3 : index
    %423 = memref.load %arg11[%c3_172] : memref<64xf32, #tpu.memory_space<smem>>
    %cst_173 = arith.constant 0.699999988 : f32
    %424 = arith.mulf %cst_173, %423 : f32
    %425 = arith.addf %422, %424 : f32
    %c4_i32_174 = arith.constant 4 : i32
    %426 = arith.cmpi sgt, %376, %c4_i32_174 : i32
    %c63_i32_175 = arith.constant 63 : i32
    %427 = arith.select %426, %420, %c63_i32_175 : i32
    %428 = arith.index_cast %427 : i32 to index
    %429 = memref.load %arg11[%428] : memref<64xf32, #tpu.memory_space<smem>>
    memref.store %425, %arg11[%428] : memref<64xf32, #tpu.memory_space<smem>>
    %430 = arith.select %426, %425, %418 : f32
    %431 = arith.extui %426 : i1 to i32
    %432 = arith.addi %420, %431 : i32
    %c37 = arith.constant 37 : index
    %433 = memref.load %arg0[%c37] : memref<64xf32, #tpu.memory_space<smem>>
    %cst_176 = arith.constant 3.000000e-01 : f32
    %434 = arith.mulf %cst_176, %433 : f32
    %c4_177 = arith.constant 4 : index
    %435 = memref.load %arg11[%c4_177] : memref<64xf32, #tpu.memory_space<smem>>
    %cst_178 = arith.constant 0.699999988 : f32
    %436 = arith.mulf %cst_178, %435 : f32
    %437 = arith.addf %434, %436 : f32
    %c5_i32_179 = arith.constant 5 : i32
    %438 = arith.cmpi sgt, %376, %c5_i32_179 : i32
    %c63_i32_180 = arith.constant 63 : i32
    %439 = arith.select %438, %432, %c63_i32_180 : i32
    %440 = arith.index_cast %439 : i32 to index
    %441 = memref.load %arg11[%440] : memref<64xf32, #tpu.memory_space<smem>>
    memref.store %437, %arg11[%440] : memref<64xf32, #tpu.memory_space<smem>>
    %442 = arith.select %438, %437, %430 : f32
    %443 = arith.extui %438 : i1 to i32
    %444 = arith.addi %432, %443 : i32
    %c38 = arith.constant 38 : index
    %445 = memref.load %arg0[%c38] : memref<64xf32, #tpu.memory_space<smem>>
    %cst_181 = arith.constant 3.000000e-01 : f32
    %446 = arith.mulf %cst_181, %445 : f32
    %c5_182 = arith.constant 5 : index
    %447 = memref.load %arg11[%c5_182] : memref<64xf32, #tpu.memory_space<smem>>
    %cst_183 = arith.constant 0.699999988 : f32
    %448 = arith.mulf %cst_183, %447 : f32
    %449 = arith.addf %446, %448 : f32
    %c6_i32_184 = arith.constant 6 : i32
    %450 = arith.cmpi sgt, %376, %c6_i32_184 : i32
    %c63_i32_185 = arith.constant 63 : i32
    %451 = arith.select %450, %444, %c63_i32_185 : i32
    %452 = arith.index_cast %451 : i32 to index
    %453 = memref.load %arg11[%452] : memref<64xf32, #tpu.memory_space<smem>>
    memref.store %449, %arg11[%452] : memref<64xf32, #tpu.memory_space<smem>>
    %454 = arith.select %450, %449, %442 : f32
    %455 = arith.extui %450 : i1 to i32
    %456 = arith.addi %444, %455 : i32
    %c39 = arith.constant 39 : index
    %457 = memref.load %arg0[%c39] : memref<64xf32, #tpu.memory_space<smem>>
    %cst_186 = arith.constant 3.000000e-01 : f32
    %458 = arith.mulf %cst_186, %457 : f32
    %c6_187 = arith.constant 6 : index
    %459 = memref.load %arg11[%c6_187] : memref<64xf32, #tpu.memory_space<smem>>
    %cst_188 = arith.constant 0.699999988 : f32
    %460 = arith.mulf %cst_188, %459 : f32
    %461 = arith.addf %458, %460 : f32
    %c7_i32_189 = arith.constant 7 : i32
    %462 = arith.cmpi sgt, %376, %c7_i32_189 : i32
    %c63_i32_190 = arith.constant 63 : i32
    %463 = arith.select %462, %456, %c63_i32_190 : i32
    %464 = arith.index_cast %463 : i32 to index
    %465 = memref.load %arg11[%464] : memref<64xf32, #tpu.memory_space<smem>>
    memref.store %461, %arg11[%464] : memref<64xf32, #tpu.memory_space<smem>>
    %466 = arith.select %462, %461, %454 : f32
    %467 = arith.extui %462 : i1 to i32
    %468 = arith.addi %456, %467 : i32
    %c4_191 = arith.constant 4 : index
    %469 = memref.load %arg9[%c4_191] : memref<8xf32, #tpu.memory_space<smem>>
    memref.store %466, %arg9[%c4_191] : memref<8xf32, #tpu.memory_space<smem>>
    %c5_192 = arith.constant 5 : index
    %470 = memref.load %arg1[%c5_192] : memref<8xi32, #tpu.memory_space<smem>>
    %c40 = arith.constant 40 : index
    %471 = memref.load %arg0[%c40] : memref<64xf32, #tpu.memory_space<smem>>
    %c0_i32_193 = arith.constant 0 : i32
    %472 = arith.cmpi sgt, %470, %c0_i32_193 : i32
    %c63_i32_194 = arith.constant 63 : i32
    %473 = arith.select %472, %468, %c63_i32_194 : i32
    %474 = arith.index_cast %473 : i32 to index
    %475 = memref.load %arg11[%474] : memref<64xf32, #tpu.memory_space<smem>>
    memref.store %471, %arg11[%474] : memref<64xf32, #tpu.memory_space<smem>>
    %cst_195 = arith.constant 0.000000e+00 : f32
    %476 = arith.select %472, %471, %cst_195 : f32
    %477 = arith.extui %472 : i1 to i32
    %478 = arith.addi %468, %477 : i32
    %c41 = arith.constant 41 : index
    %479 = memref.load %arg0[%c41] : memref<64xf32, #tpu.memory_space<smem>>
    %cst_196 = arith.constant 3.000000e-01 : f32
    %480 = arith.mulf %cst_196, %479 : f32
    %c0_197 = arith.constant 0 : index
    %481 = memref.load %arg11[%c0_197] : memref<64xf32, #tpu.memory_space<smem>>
    %cst_198 = arith.constant 0.699999988 : f32
    %482 = arith.mulf %cst_198, %481 : f32
    %483 = arith.addf %480, %482 : f32
    %c1_i32_199 = arith.constant 1 : i32
    %484 = arith.cmpi sgt, %470, %c1_i32_199 : i32
    %c63_i32_200 = arith.constant 63 : i32
    %485 = arith.select %484, %478, %c63_i32_200 : i32
    %486 = arith.index_cast %485 : i32 to index
    %487 = memref.load %arg11[%486] : memref<64xf32, #tpu.memory_space<smem>>
    memref.store %483, %arg11[%486] : memref<64xf32, #tpu.memory_space<smem>>
    %488 = arith.select %484, %483, %476 : f32
    %489 = arith.extui %484 : i1 to i32
    %490 = arith.addi %478, %489 : i32
    %c42 = arith.constant 42 : index
    %491 = memref.load %arg0[%c42] : memref<64xf32, #tpu.memory_space<smem>>
    %cst_201 = arith.constant 3.000000e-01 : f32
    %492 = arith.mulf %cst_201, %491 : f32
    %c1_202 = arith.constant 1 : index
    %493 = memref.load %arg11[%c1_202] : memref<64xf32, #tpu.memory_space<smem>>
    %cst_203 = arith.constant 0.699999988 : f32
    %494 = arith.mulf %cst_203, %493 : f32
    %495 = arith.addf %492, %494 : f32
    %c2_i32_204 = arith.constant 2 : i32
    %496 = arith.cmpi sgt, %470, %c2_i32_204 : i32
    %c63_i32_205 = arith.constant 63 : i32
    %497 = arith.select %496, %490, %c63_i32_205 : i32
    %498 = arith.index_cast %497 : i32 to index
    %499 = memref.load %arg11[%498] : memref<64xf32, #tpu.memory_space<smem>>
    memref.store %495, %arg11[%498] : memref<64xf32, #tpu.memory_space<smem>>
    %500 = arith.select %496, %495, %488 : f32
    %501 = arith.extui %496 : i1 to i32
    %502 = arith.addi %490, %501 : i32
    %c43 = arith.constant 43 : index
    %503 = memref.load %arg0[%c43] : memref<64xf32, #tpu.memory_space<smem>>
    %cst_206 = arith.constant 3.000000e-01 : f32
    %504 = arith.mulf %cst_206, %503 : f32
    %c2_207 = arith.constant 2 : index
    %505 = memref.load %arg11[%c2_207] : memref<64xf32, #tpu.memory_space<smem>>
    %cst_208 = arith.constant 0.699999988 : f32
    %506 = arith.mulf %cst_208, %505 : f32
    %507 = arith.addf %504, %506 : f32
    %c3_i32_209 = arith.constant 3 : i32
    %508 = arith.cmpi sgt, %470, %c3_i32_209 : i32
    %c63_i32_210 = arith.constant 63 : i32
    %509 = arith.select %508, %502, %c63_i32_210 : i32
    %510 = arith.index_cast %509 : i32 to index
    %511 = memref.load %arg11[%510] : memref<64xf32, #tpu.memory_space<smem>>
    memref.store %507, %arg11[%510] : memref<64xf32, #tpu.memory_space<smem>>
    %512 = arith.select %508, %507, %500 : f32
    %513 = arith.extui %508 : i1 to i32
    %514 = arith.addi %502, %513 : i32
    %c44 = arith.constant 44 : index
    %515 = memref.load %arg0[%c44] : memref<64xf32, #tpu.memory_space<smem>>
    %cst_211 = arith.constant 3.000000e-01 : f32
    %516 = arith.mulf %cst_211, %515 : f32
    %c3_212 = arith.constant 3 : index
    %517 = memref.load %arg11[%c3_212] : memref<64xf32, #tpu.memory_space<smem>>
    %cst_213 = arith.constant 0.699999988 : f32
    %518 = arith.mulf %cst_213, %517 : f32
    %519 = arith.addf %516, %518 : f32
    %c4_i32_214 = arith.constant 4 : i32
    %520 = arith.cmpi sgt, %470, %c4_i32_214 : i32
    %c63_i32_215 = arith.constant 63 : i32
    %521 = arith.select %520, %514, %c63_i32_215 : i32
    %522 = arith.index_cast %521 : i32 to index
    %523 = memref.load %arg11[%522] : memref<64xf32, #tpu.memory_space<smem>>
    memref.store %519, %arg11[%522] : memref<64xf32, #tpu.memory_space<smem>>
    %524 = arith.select %520, %519, %512 : f32
    %525 = arith.extui %520 : i1 to i32
    %526 = arith.addi %514, %525 : i32
    %c45 = arith.constant 45 : index
    %527 = memref.load %arg0[%c45] : memref<64xf32, #tpu.memory_space<smem>>
    %cst_216 = arith.constant 3.000000e-01 : f32
    %528 = arith.mulf %cst_216, %527 : f32
    %c4_217 = arith.constant 4 : index
    %529 = memref.load %arg11[%c4_217] : memref<64xf32, #tpu.memory_space<smem>>
    %cst_218 = arith.constant 0.699999988 : f32
    %530 = arith.mulf %cst_218, %529 : f32
    %531 = arith.addf %528, %530 : f32
    %c5_i32_219 = arith.constant 5 : i32
    %532 = arith.cmpi sgt, %470, %c5_i32_219 : i32
    %c63_i32_220 = arith.constant 63 : i32
    %533 = arith.select %532, %526, %c63_i32_220 : i32
    %534 = arith.index_cast %533 : i32 to index
    %535 = memref.load %arg11[%534] : memref<64xf32, #tpu.memory_space<smem>>
    memref.store %531, %arg11[%534] : memref<64xf32, #tpu.memory_space<smem>>
    %536 = arith.select %532, %531, %524 : f32
    %537 = arith.extui %532 : i1 to i32
    %538 = arith.addi %526, %537 : i32
    %c46 = arith.constant 46 : index
    %539 = memref.load %arg0[%c46] : memref<64xf32, #tpu.memory_space<smem>>
    %cst_221 = arith.constant 3.000000e-01 : f32
    %540 = arith.mulf %cst_221, %539 : f32
    %c5_222 = arith.constant 5 : index
    %541 = memref.load %arg11[%c5_222] : memref<64xf32, #tpu.memory_space<smem>>
    %cst_223 = arith.constant 0.699999988 : f32
    %542 = arith.mulf %cst_223, %541 : f32
    %543 = arith.addf %540, %542 : f32
    %c6_i32_224 = arith.constant 6 : i32
    %544 = arith.cmpi sgt, %470, %c6_i32_224 : i32
    %c63_i32_225 = arith.constant 63 : i32
    %545 = arith.select %544, %538, %c63_i32_225 : i32
    %546 = arith.index_cast %545 : i32 to index
    %547 = memref.load %arg11[%546] : memref<64xf32, #tpu.memory_space<smem>>
    memref.store %543, %arg11[%546] : memref<64xf32, #tpu.memory_space<smem>>
    %548 = arith.select %544, %543, %536 : f32
    %549 = arith.extui %544 : i1 to i32
    %550 = arith.addi %538, %549 : i32
    %c47 = arith.constant 47 : index
    %551 = memref.load %arg0[%c47] : memref<64xf32, #tpu.memory_space<smem>>
    %cst_226 = arith.constant 3.000000e-01 : f32
    %552 = arith.mulf %cst_226, %551 : f32
    %c6_227 = arith.constant 6 : index
    %553 = memref.load %arg11[%c6_227] : memref<64xf32, #tpu.memory_space<smem>>
    %cst_228 = arith.constant 0.699999988 : f32
    %554 = arith.mulf %cst_228, %553 : f32
    %555 = arith.addf %552, %554 : f32
    %c7_i32_229 = arith.constant 7 : i32
    %556 = arith.cmpi sgt, %470, %c7_i32_229 : i32
    %c63_i32_230 = arith.constant 63 : i32
    %557 = arith.select %556, %550, %c63_i32_230 : i32
    %558 = arith.index_cast %557 : i32 to index
    %559 = memref.load %arg11[%558] : memref<64xf32, #tpu.memory_space<smem>>
    memref.store %555, %arg11[%558] : memref<64xf32, #tpu.memory_space<smem>>
    %560 = arith.select %556, %555, %548 : f32
    %561 = arith.extui %556 : i1 to i32
    %562 = arith.addi %550, %561 : i32
    %c5_231 = arith.constant 5 : index
    %563 = memref.load %arg9[%c5_231] : memref<8xf32, #tpu.memory_space<smem>>
    memref.store %560, %arg9[%c5_231] : memref<8xf32, #tpu.memory_space<smem>>
    %c6_232 = arith.constant 6 : index
    %564 = memref.load %arg1[%c6_232] : memref<8xi32, #tpu.memory_space<smem>>
    %c48 = arith.constant 48 : index
    %565 = memref.load %arg0[%c48] : memref<64xf32, #tpu.memory_space<smem>>
    %c0_i32_233 = arith.constant 0 : i32
    %566 = arith.cmpi sgt, %564, %c0_i32_233 : i32
    %c63_i32_234 = arith.constant 63 : i32
    %567 = arith.select %566, %562, %c63_i32_234 : i32
    %568 = arith.index_cast %567 : i32 to index
    %569 = memref.load %arg11[%568] : memref<64xf32, #tpu.memory_space<smem>>
    memref.store %565, %arg11[%568] : memref<64xf32, #tpu.memory_space<smem>>
    %cst_235 = arith.constant 0.000000e+00 : f32
    %570 = arith.select %566, %565, %cst_235 : f32
    %571 = arith.extui %566 : i1 to i32
    %572 = arith.addi %562, %571 : i32
    %c49 = arith.constant 49 : index
    %573 = memref.load %arg0[%c49] : memref<64xf32, #tpu.memory_space<smem>>
    %cst_236 = arith.constant 3.000000e-01 : f32
    %574 = arith.mulf %cst_236, %573 : f32
    %c0_237 = arith.constant 0 : index
    %575 = memref.load %arg11[%c0_237] : memref<64xf32, #tpu.memory_space<smem>>
    %cst_238 = arith.constant 0.699999988 : f32
    %576 = arith.mulf %cst_238, %575 : f32
    %577 = arith.addf %574, %576 : f32
    %c1_i32_239 = arith.constant 1 : i32
    %578 = arith.cmpi sgt, %564, %c1_i32_239 : i32
    %c63_i32_240 = arith.constant 63 : i32
    %579 = arith.select %578, %572, %c63_i32_240 : i32
    %580 = arith.index_cast %579 : i32 to index
    %581 = memref.load %arg11[%580] : memref<64xf32, #tpu.memory_space<smem>>
    memref.store %577, %arg11[%580] : memref<64xf32, #tpu.memory_space<smem>>
    %582 = arith.select %578, %577, %570 : f32
    %583 = arith.extui %578 : i1 to i32
    %584 = arith.addi %572, %583 : i32
    %c50 = arith.constant 50 : index
    %585 = memref.load %arg0[%c50] : memref<64xf32, #tpu.memory_space<smem>>
    %cst_241 = arith.constant 3.000000e-01 : f32
    %586 = arith.mulf %cst_241, %585 : f32
    %c1_242 = arith.constant 1 : index
    %587 = memref.load %arg11[%c1_242] : memref<64xf32, #tpu.memory_space<smem>>
    %cst_243 = arith.constant 0.699999988 : f32
    %588 = arith.mulf %cst_243, %587 : f32
    %589 = arith.addf %586, %588 : f32
    %c2_i32_244 = arith.constant 2 : i32
    %590 = arith.cmpi sgt, %564, %c2_i32_244 : i32
    %c63_i32_245 = arith.constant 63 : i32
    %591 = arith.select %590, %584, %c63_i32_245 : i32
    %592 = arith.index_cast %591 : i32 to index
    %593 = memref.load %arg11[%592] : memref<64xf32, #tpu.memory_space<smem>>
    memref.store %589, %arg11[%592] : memref<64xf32, #tpu.memory_space<smem>>
    %594 = arith.select %590, %589, %582 : f32
    %595 = arith.extui %590 : i1 to i32
    %596 = arith.addi %584, %595 : i32
    %c51 = arith.constant 51 : index
    %597 = memref.load %arg0[%c51] : memref<64xf32, #tpu.memory_space<smem>>
    %cst_246 = arith.constant 3.000000e-01 : f32
    %598 = arith.mulf %cst_246, %597 : f32
    %c2_247 = arith.constant 2 : index
    %599 = memref.load %arg11[%c2_247] : memref<64xf32, #tpu.memory_space<smem>>
    %cst_248 = arith.constant 0.699999988 : f32
    %600 = arith.mulf %cst_248, %599 : f32
    %601 = arith.addf %598, %600 : f32
    %c3_i32_249 = arith.constant 3 : i32
    %602 = arith.cmpi sgt, %564, %c3_i32_249 : i32
    %c63_i32_250 = arith.constant 63 : i32
    %603 = arith.select %602, %596, %c63_i32_250 : i32
    %604 = arith.index_cast %603 : i32 to index
    %605 = memref.load %arg11[%604] : memref<64xf32, #tpu.memory_space<smem>>
    memref.store %601, %arg11[%604] : memref<64xf32, #tpu.memory_space<smem>>
    %606 = arith.select %602, %601, %594 : f32
    %607 = arith.extui %602 : i1 to i32
    %608 = arith.addi %596, %607 : i32
    %c52 = arith.constant 52 : index
    %609 = memref.load %arg0[%c52] : memref<64xf32, #tpu.memory_space<smem>>
    %cst_251 = arith.constant 3.000000e-01 : f32
    %610 = arith.mulf %cst_251, %609 : f32
    %c3_252 = arith.constant 3 : index
    %611 = memref.load %arg11[%c3_252] : memref<64xf32, #tpu.memory_space<smem>>
    %cst_253 = arith.constant 0.699999988 : f32
    %612 = arith.mulf %cst_253, %611 : f32
    %613 = arith.addf %610, %612 : f32
    %c4_i32_254 = arith.constant 4 : i32
    %614 = arith.cmpi sgt, %564, %c4_i32_254 : i32
    %c63_i32_255 = arith.constant 63 : i32
    %615 = arith.select %614, %608, %c63_i32_255 : i32
    %616 = arith.index_cast %615 : i32 to index
    %617 = memref.load %arg11[%616] : memref<64xf32, #tpu.memory_space<smem>>
    memref.store %613, %arg11[%616] : memref<64xf32, #tpu.memory_space<smem>>
    %618 = arith.select %614, %613, %606 : f32
    %619 = arith.extui %614 : i1 to i32
    %620 = arith.addi %608, %619 : i32
    %c53 = arith.constant 53 : index
    %621 = memref.load %arg0[%c53] : memref<64xf32, #tpu.memory_space<smem>>
    %cst_256 = arith.constant 3.000000e-01 : f32
    %622 = arith.mulf %cst_256, %621 : f32
    %c4_257 = arith.constant 4 : index
    %623 = memref.load %arg11[%c4_257] : memref<64xf32, #tpu.memory_space<smem>>
    %cst_258 = arith.constant 0.699999988 : f32
    %624 = arith.mulf %cst_258, %623 : f32
    %625 = arith.addf %622, %624 : f32
    %c5_i32_259 = arith.constant 5 : i32
    %626 = arith.cmpi sgt, %564, %c5_i32_259 : i32
    %c63_i32_260 = arith.constant 63 : i32
    %627 = arith.select %626, %620, %c63_i32_260 : i32
    %628 = arith.index_cast %627 : i32 to index
    %629 = memref.load %arg11[%628] : memref<64xf32, #tpu.memory_space<smem>>
    memref.store %625, %arg11[%628] : memref<64xf32, #tpu.memory_space<smem>>
    %630 = arith.select %626, %625, %618 : f32
    %631 = arith.extui %626 : i1 to i32
    %632 = arith.addi %620, %631 : i32
    %c54 = arith.constant 54 : index
    %633 = memref.load %arg0[%c54] : memref<64xf32, #tpu.memory_space<smem>>
    %cst_261 = arith.constant 3.000000e-01 : f32
    %634 = arith.mulf %cst_261, %633 : f32
    %c5_262 = arith.constant 5 : index
    %635 = memref.load %arg11[%c5_262] : memref<64xf32, #tpu.memory_space<smem>>
    %cst_263 = arith.constant 0.699999988 : f32
    %636 = arith.mulf %cst_263, %635 : f32
    %637 = arith.addf %634, %636 : f32
    %c6_i32_264 = arith.constant 6 : i32
    %638 = arith.cmpi sgt, %564, %c6_i32_264 : i32
    %c63_i32_265 = arith.constant 63 : i32
    %639 = arith.select %638, %632, %c63_i32_265 : i32
    %640 = arith.index_cast %639 : i32 to index
    %641 = memref.load %arg11[%640] : memref<64xf32, #tpu.memory_space<smem>>
    memref.store %637, %arg11[%640] : memref<64xf32, #tpu.memory_space<smem>>
    %642 = arith.select %638, %637, %630 : f32
    %643 = arith.extui %638 : i1 to i32
    %644 = arith.addi %632, %643 : i32
    %c55 = arith.constant 55 : index
    %645 = memref.load %arg0[%c55] : memref<64xf32, #tpu.memory_space<smem>>
    %cst_266 = arith.constant 3.000000e-01 : f32
    %646 = arith.mulf %cst_266, %645 : f32
    %c6_267 = arith.constant 6 : index
    %647 = memref.load %arg11[%c6_267] : memref<64xf32, #tpu.memory_space<smem>>
    %cst_268 = arith.constant 0.699999988 : f32
    %648 = arith.mulf %cst_268, %647 : f32
    %649 = arith.addf %646, %648 : f32
    %c7_i32_269 = arith.constant 7 : i32
    %650 = arith.cmpi sgt, %564, %c7_i32_269 : i32
    %c63_i32_270 = arith.constant 63 : i32
    %651 = arith.select %650, %644, %c63_i32_270 : i32
    %652 = arith.index_cast %651 : i32 to index
    %653 = memref.load %arg11[%652] : memref<64xf32, #tpu.memory_space<smem>>
    memref.store %649, %arg11[%652] : memref<64xf32, #tpu.memory_space<smem>>
    %654 = arith.select %650, %649, %642 : f32
    %655 = arith.extui %650 : i1 to i32
    %656 = arith.addi %644, %655 : i32
    %c6_271 = arith.constant 6 : index
    %657 = memref.load %arg9[%c6_271] : memref<8xf32, #tpu.memory_space<smem>>
    memref.store %654, %arg9[%c6_271] : memref<8xf32, #tpu.memory_space<smem>>
    %c7_272 = arith.constant 7 : index
    %658 = memref.load %arg1[%c7_272] : memref<8xi32, #tpu.memory_space<smem>>
    %c56 = arith.constant 56 : index
    %659 = memref.load %arg0[%c56] : memref<64xf32, #tpu.memory_space<smem>>
    %c0_i32_273 = arith.constant 0 : i32
    %660 = arith.cmpi sgt, %658, %c0_i32_273 : i32
    %c63_i32_274 = arith.constant 63 : i32
    %661 = arith.select %660, %656, %c63_i32_274 : i32
    %662 = arith.index_cast %661 : i32 to index
    %663 = memref.load %arg11[%662] : memref<64xf32, #tpu.memory_space<smem>>
    memref.store %659, %arg11[%662] : memref<64xf32, #tpu.memory_space<smem>>
    %cst_275 = arith.constant 0.000000e+00 : f32
    %664 = arith.select %660, %659, %cst_275 : f32
    %665 = arith.extui %660 : i1 to i32
    %666 = arith.addi %656, %665 : i32
    %c57 = arith.constant 57 : index
    %667 = memref.load %arg0[%c57] : memref<64xf32, #tpu.memory_space<smem>>
    %cst_276 = arith.constant 3.000000e-01 : f32
    %668 = arith.mulf %cst_276, %667 : f32
    %c0_277 = arith.constant 0 : index
    %669 = memref.load %arg11[%c0_277] : memref<64xf32, #tpu.memory_space<smem>>
    %cst_278 = arith.constant 0.699999988 : f32
    %670 = arith.mulf %cst_278, %669 : f32
    %671 = arith.addf %668, %670 : f32
    %c1_i32_279 = arith.constant 1 : i32
    %672 = arith.cmpi sgt, %658, %c1_i32_279 : i32
    %c63_i32_280 = arith.constant 63 : i32
    %673 = arith.select %672, %666, %c63_i32_280 : i32
    %674 = arith.index_cast %673 : i32 to index
    %675 = memref.load %arg11[%674] : memref<64xf32, #tpu.memory_space<smem>>
    memref.store %671, %arg11[%674] : memref<64xf32, #tpu.memory_space<smem>>
    %676 = arith.select %672, %671, %664 : f32
    %677 = arith.extui %672 : i1 to i32
    %678 = arith.addi %666, %677 : i32
    %c58 = arith.constant 58 : index
    %679 = memref.load %arg0[%c58] : memref<64xf32, #tpu.memory_space<smem>>
    %cst_281 = arith.constant 3.000000e-01 : f32
    %680 = arith.mulf %cst_281, %679 : f32
    %c1_282 = arith.constant 1 : index
    %681 = memref.load %arg11[%c1_282] : memref<64xf32, #tpu.memory_space<smem>>
    %cst_283 = arith.constant 0.699999988 : f32
    %682 = arith.mulf %cst_283, %681 : f32
    %683 = arith.addf %680, %682 : f32
    %c2_i32_284 = arith.constant 2 : i32
    %684 = arith.cmpi sgt, %658, %c2_i32_284 : i32
    %c63_i32_285 = arith.constant 63 : i32
    %685 = arith.select %684, %678, %c63_i32_285 : i32
    %686 = arith.index_cast %685 : i32 to index
    %687 = memref.load %arg11[%686] : memref<64xf32, #tpu.memory_space<smem>>
    memref.store %683, %arg11[%686] : memref<64xf32, #tpu.memory_space<smem>>
    %688 = arith.select %684, %683, %676 : f32
    %689 = arith.extui %684 : i1 to i32
    %690 = arith.addi %678, %689 : i32
    %c59 = arith.constant 59 : index
    %691 = memref.load %arg0[%c59] : memref<64xf32, #tpu.memory_space<smem>>
    %cst_286 = arith.constant 3.000000e-01 : f32
    %692 = arith.mulf %cst_286, %691 : f32
    %c2_287 = arith.constant 2 : index
    %693 = memref.load %arg11[%c2_287] : memref<64xf32, #tpu.memory_space<smem>>
    %cst_288 = arith.constant 0.699999988 : f32
    %694 = arith.mulf %cst_288, %693 : f32
    %695 = arith.addf %692, %694 : f32
    %c3_i32_289 = arith.constant 3 : i32
    %696 = arith.cmpi sgt, %658, %c3_i32_289 : i32
    %c63_i32_290 = arith.constant 63 : i32
    %697 = arith.select %696, %690, %c63_i32_290 : i32
    %698 = arith.index_cast %697 : i32 to index
    %699 = memref.load %arg11[%698] : memref<64xf32, #tpu.memory_space<smem>>
    memref.store %695, %arg11[%698] : memref<64xf32, #tpu.memory_space<smem>>
    %700 = arith.select %696, %695, %688 : f32
    %701 = arith.extui %696 : i1 to i32
    %702 = arith.addi %690, %701 : i32
    %c60 = arith.constant 60 : index
    %703 = memref.load %arg0[%c60] : memref<64xf32, #tpu.memory_space<smem>>
    %cst_291 = arith.constant 3.000000e-01 : f32
    %704 = arith.mulf %cst_291, %703 : f32
    %c3_292 = arith.constant 3 : index
    %705 = memref.load %arg11[%c3_292] : memref<64xf32, #tpu.memory_space<smem>>
    %cst_293 = arith.constant 0.699999988 : f32
    %706 = arith.mulf %cst_293, %705 : f32
    %707 = arith.addf %704, %706 : f32
    %c4_i32_294 = arith.constant 4 : i32
    %708 = arith.cmpi sgt, %658, %c4_i32_294 : i32
    %c63_i32_295 = arith.constant 63 : i32
    %709 = arith.select %708, %702, %c63_i32_295 : i32
    %710 = arith.index_cast %709 : i32 to index
    %711 = memref.load %arg11[%710] : memref<64xf32, #tpu.memory_space<smem>>
    memref.store %707, %arg11[%710] : memref<64xf32, #tpu.memory_space<smem>>
    %712 = arith.select %708, %707, %700 : f32
    %713 = arith.extui %708 : i1 to i32
    %714 = arith.addi %702, %713 : i32
    %c61 = arith.constant 61 : index
    %715 = memref.load %arg0[%c61] : memref<64xf32, #tpu.memory_space<smem>>
    %cst_296 = arith.constant 3.000000e-01 : f32
    %716 = arith.mulf %cst_296, %715 : f32
    %c4_297 = arith.constant 4 : index
    %717 = memref.load %arg11[%c4_297] : memref<64xf32, #tpu.memory_space<smem>>
    %cst_298 = arith.constant 0.699999988 : f32
    %718 = arith.mulf %cst_298, %717 : f32
    %719 = arith.addf %716, %718 : f32
    %c5_i32_299 = arith.constant 5 : i32
    %720 = arith.cmpi sgt, %658, %c5_i32_299 : i32
    %c63_i32_300 = arith.constant 63 : i32
    %721 = arith.select %720, %714, %c63_i32_300 : i32
    %722 = arith.index_cast %721 : i32 to index
    %723 = memref.load %arg11[%722] : memref<64xf32, #tpu.memory_space<smem>>
    memref.store %719, %arg11[%722] : memref<64xf32, #tpu.memory_space<smem>>
    %724 = arith.select %720, %719, %712 : f32
    %725 = arith.extui %720 : i1 to i32
    %726 = arith.addi %714, %725 : i32
    %c62 = arith.constant 62 : index
    %727 = memref.load %arg0[%c62] : memref<64xf32, #tpu.memory_space<smem>>
    %cst_301 = arith.constant 3.000000e-01 : f32
    %728 = arith.mulf %cst_301, %727 : f32
    %c5_302 = arith.constant 5 : index
    %729 = memref.load %arg11[%c5_302] : memref<64xf32, #tpu.memory_space<smem>>
    %cst_303 = arith.constant 0.699999988 : f32
    %730 = arith.mulf %cst_303, %729 : f32
    %731 = arith.addf %728, %730 : f32
    %c6_i32_304 = arith.constant 6 : i32
    %732 = arith.cmpi sgt, %658, %c6_i32_304 : i32
    %c63_i32_305 = arith.constant 63 : i32
    %733 = arith.select %732, %726, %c63_i32_305 : i32
    %734 = arith.index_cast %733 : i32 to index
    %735 = memref.load %arg11[%734] : memref<64xf32, #tpu.memory_space<smem>>
    memref.store %731, %arg11[%734] : memref<64xf32, #tpu.memory_space<smem>>
    %736 = arith.select %732, %731, %724 : f32
    %737 = arith.extui %732 : i1 to i32
    %738 = arith.addi %726, %737 : i32
    %c63 = arith.constant 63 : index
    %739 = memref.load %arg0[%c63] : memref<64xf32, #tpu.memory_space<smem>>
    %cst_306 = arith.constant 3.000000e-01 : f32
    %740 = arith.mulf %cst_306, %739 : f32
    %c6_307 = arith.constant 6 : index
    %741 = memref.load %arg11[%c6_307] : memref<64xf32, #tpu.memory_space<smem>>
    %cst_308 = arith.constant 0.699999988 : f32
    %742 = arith.mulf %cst_308, %741 : f32
    %743 = arith.addf %740, %742 : f32
    %c7_i32_309 = arith.constant 7 : i32
    %744 = arith.cmpi sgt, %658, %c7_i32_309 : i32
    %c63_i32_310 = arith.constant 63 : i32
    %745 = arith.select %744, %738, %c63_i32_310 : i32
    %746 = arith.index_cast %745 : i32 to index
    %747 = memref.load %arg11[%746] : memref<64xf32, #tpu.memory_space<smem>>
    memref.store %743, %arg11[%746] : memref<64xf32, #tpu.memory_space<smem>>
    %748 = arith.select %744, %743, %736 : f32
    %c7_311 = arith.constant 7 : index
    %749 = memref.load %arg9[%c7_311] : memref<8xf32, #tpu.memory_space<smem>>
    memref.store %748, %arg9[%c7_311] : memref<8xf32, #tpu.memory_space<smem>>
    %c0_312 = arith.constant 0 : index
    %c0_313 = arith.constant 0 : index
    %750 = vector.load %arg3[%c0_312, %c0_313] : memref<8x96xf32, #tpu.memory_space<vmem>>, vector<8x96xf32>
    %c0_314 = arith.constant 0 : index
    %c0_315 = arith.constant 0 : index
    %751 = vector.load %arg6[%c0_314, %c0_315] : memref<1x96xf32, #tpu.memory_space<vmem>>, vector<1x96xf32>
    %752 = vector.broadcast %751 : vector<1x96xf32> to vector<8x96xf32>
    %753 = arith.mulf %750, %752 : vector<8x96xf32>
    %cst_316 = arith.constant dense<0.000000e+00> : vector<8xf32>
    %754 = vector.multi_reduction <add>, %753, %cst_316 [1] : vector<8x96xf32> to vector<8xf32>
    %755 = vector.shape_cast %754 : vector<8xf32> to vector<8x1xf32>
    %c0_317 = arith.constant 0 : index
    %756 = memref.load %arg2[%c0_317] : memref<3xf32, #tpu.memory_space<smem>>
    %757 = vector.broadcast %756 : f32 to vector<8x1xf32>
    %758 = arith.addf %755, %757 : vector<8x1xf32>
    %cst_318 = arith.constant 0.000000e+00 : f32
    %759 = vector.broadcast %cst_318 : f32 to vector<8x1xf32>
    %760 = arith.maximumf %758, %759 : vector<8x1xf32>
    %c0_319 = arith.constant 0 : index
    %c0_320 = arith.constant 0 : index
    %761 = vector.load %arg4[%c0_319, %c0_320] : memref<8x128xf32, #tpu.memory_space<vmem>>, vector<8x128xf32>
    %c0_321 = arith.constant 0 : index
    %c0_322 = arith.constant 0 : index
    %762 = vector.load %arg7[%c0_321, %c0_322] : memref<1x128xf32, #tpu.memory_space<vmem>>, vector<1x128xf32>
    %763 = vector.broadcast %762 : vector<1x128xf32> to vector<8x128xf32>
    %764 = arith.mulf %761, %763 : vector<8x128xf32>
    %cst_323 = arith.constant dense<0.000000e+00> : vector<8xf32>
    %765 = vector.multi_reduction <add>, %764, %cst_323 [1] : vector<8x128xf32> to vector<8xf32>
    %766 = vector.shape_cast %765 : vector<8xf32> to vector<8x1xf32>
    %c1_324 = arith.constant 1 : index
    %767 = memref.load %arg2[%c1_324] : memref<3xf32, #tpu.memory_space<smem>>
    %768 = vector.broadcast %767 : f32 to vector<8x1xf32>
    %769 = arith.addf %766, %768 : vector<8x1xf32>
    %cst_325 = arith.constant 0.000000e+00 : f32
    %770 = vector.broadcast %cst_325 : f32 to vector<8x1xf32>
    %771 = arith.maximumf %769, %770 : vector<8x1xf32>
    %c0_326 = arith.constant 0 : index
    %c0_327 = arith.constant 0 : index
    %772 = vector.load %arg5[%c0_326, %c0_327] : memref<8x128xf32, #tpu.memory_space<vmem>>, vector<8x128xf32>
    %c0_328 = arith.constant 0 : index
    %c0_329 = arith.constant 0 : index
    %773 = vector.load %arg8[%c0_328, %c0_329] : memref<1x128xf32, #tpu.memory_space<vmem>>, vector<1x128xf32>
    %774 = vector.broadcast %773 : vector<1x128xf32> to vector<8x128xf32>
    %775 = arith.mulf %772, %774 : vector<8x128xf32>
    %cst_330 = arith.constant dense<0.000000e+00> : vector<8xf32>
    %776 = vector.multi_reduction <add>, %775, %cst_330 [1] : vector<8x128xf32> to vector<8xf32>
    %777 = vector.shape_cast %776 : vector<8xf32> to vector<8x1xf32>
    %c2_331 = arith.constant 2 : index
    %778 = memref.load %arg2[%c2_331] : memref<3xf32, #tpu.memory_space<smem>>
    %779 = vector.broadcast %778 : f32 to vector<8x1xf32>
    %780 = arith.addf %777, %779 : vector<8x1xf32>
    %cst_332 = arith.constant 0.000000e+00 : f32
    %781 = vector.broadcast %cst_332 : f32 to vector<8x1xf32>
    %782 = arith.maximumf %780, %781 : vector<8x1xf32>
    %783 = tpu.iota {dimensions = array<i32: 1>} : vector<8x3xi32>
    %c0_i32_333 = arith.constant 0 : i32
    %784 = vector.broadcast %c0_i32_333 : i32 to vector<8x3xi32>
    %785 = arith.cmpi eq, %783, %784 : vector<8x3xi32>
    %c1_i32_334 = arith.constant 1 : i32
    %786 = vector.broadcast %c1_i32_334 : i32 to vector<8x3xi32>
    %787 = arith.cmpi eq, %783, %786 : vector<8x3xi32>
    %788 = vector.shape_cast %771 : vector<8x1xf32> to vector<8x1xf32>
    %789 = vector.broadcast %788 : vector<8x1xf32> to vector<8x3xf32>
    %790 = vector.shape_cast %782 : vector<8x1xf32> to vector<8x1xf32>
    %791 = vector.broadcast %790 : vector<8x1xf32> to vector<8x3xf32>
    %792 = arith.select %787, %789, %791 : vector<8x3xi1>, vector<8x3xf32>
    %793 = vector.shape_cast %760 : vector<8x1xf32> to vector<8x1xf32>
    %794 = vector.broadcast %793 : vector<8x1xf32> to vector<8x3xf32>
    %795 = arith.select %785, %794, %792 : vector<8x3xi1>, vector<8x3xf32>
    %c0_335 = arith.constant 0 : index
    %c0_336 = arith.constant 0 : index
    %796 = vector.load %arg10[%c0_335, %c0_336] : memref<8x3xf32, #tpu.memory_space<vmem>>, vector<8x3xf32>
    tpu.vector_store %arg10[%c0_335, %c0_336], %795 {strides = array<i32>} : memref<8x3xf32, #tpu.memory_space<vmem>>, vector<8x3xf32>,
    return
  }
}

</mosaic_0001>

<bundles_post_ra>
// kernel: pop_predict_forward.1
= control target key start
LH: loop header
LB: loop body
LE: loop exit
PB: predicated region body
PF: predicated region fallthrough
CT: control target
= control target key end

     0   :  { %16 = vsyncpa [#allocation5], 0  ;;  %s1868_s0 = inlined_call_operand.vmem [shape: f32[64], index: 0, kind: input, shape index: {}]   ;;  %s1869_s1 = inlined_call_operand.vmem [shape: s32[8], index: 1, kind: input, shape index: {}]   ;;  %s1870_s2 = inlined_call_operand.vmem [shape: f32[3], index: 2, kind: input, shape index: {}]   ;;  %s1871_s3 = inlined_call_operand.vmem [shape: f32[8,96], index: 3, kind: input, shape index: {}]   ;;  %s1872_s4 = inlined_call_operand.vmem [shape: f32[8,128], index: 4, kind: input, shape index: {}]   ;;  %s1873_s5 = inlined_call_operand.vmem [shape: f32[8,128], index: 5, kind: input, shape index: {}]   ;;  %s1874_s6 = inlined_call_operand.vmem [shape: f32[1,96], index: 6, kind: input, shape index: {}]   ;;  %s1875_s7 = inlined_call_operand.vmem [shape: f32[1,128], index: 7, kind: input, shape index: {}]   ;;  %s1876_s8 = inlined_call_operand.vmem [shape: f32[1,128], index: 8, kind: input, shape index: {}]   ;;  %s1877_s9 = inlined_call_operand.hbm [shape: f32[8], index: 9, kind: output, shape index: {0}]   ;;  %s1878_s10 = inlined_call_operand.vmem [shape: f32[8,3], index: 10, kind: output, shape index: {1}]  }
   0x1   :  { %17 = vsyncpa [#allocation7], 0  ;;  %s35_s15 = sshll.u32 %s1869_s1, 4  ;;  %s36_s15 = int_to_ptr.vmem [resolvable:$true] %s35_s15 }
   0x2   :  { %18 = vsyncpa [#allocation4], 0  ;;  %s25_s18 = sshll.u32 %s1868_s0, 4  ;;  %s1093_s19 = scalar_lea.vmem %s36_s15, 16  ;;  %s26_s18 = int_to_ptr.vmem [resolvable:$true] %s25_s18 }
   0x3   :  { %p1094_p0 = scmp.ne.s32.totalorder %s36_s15, %s1093_s19  ;;  %p1098_p1 = scmp.lt.s32.totalorder %s36_s15, %s36_s15 }
   0x4   :  { %p1099_p2 = scmp.lt.s32.totalorder %s1093_s19, %s1093_s19 }
   0x6   :  { %p1100_p3 = por %p1099_p2, %p1098_p1 }
   0x8   :  { %p1101_p4 = pnand %p1100_p3, %p1094_p0 }
   0xa   :  { %1104 = shalt.err (!%p1101_p4)
}
   0xb   :  { %s1143_s20 = smov [#allocation6]   ;;  %s1105_s21 = scalar_lea.vmem %s26_s18, 16 }
   0xc   :  { %38 = dma.vmem_to_smem %s36_s15, 16, %s1143_s20, [#allocation7]  }
   0xd   :  { %p1106_p5 = scmp.ne.s32.totalorder %s26_s18, %s1105_s21  ;;  %p1110_p6 = scmp.lt.s32.totalorder %s26_s18, %s26_s18 }
   0xe   :  { %p1111_p7 = scmp.lt.s32.totalorder %s1105_s21, %s1105_s21 }
  0x10   :  { %p1112_p8 = por %p1111_p7, %p1110_p6 }
  0x12   :  { %p1113_p9 = pnand %p1112_p8, %p1106_p5 }
  0x14   :  { %1116 = shalt.err (!%p1113_p9)
}
  0x15   :  { %s1144_s1 = smov [#allocation3]   ;;  %s45_s23 = sshll.u32 %s1870_s2, 4  ;;  %s46_s23 = int_to_ptr.vmem [resolvable:$true] %s45_s23 }
  0x16   :  { %28 = dma.vmem_to_smem %s26_s18, 16, %s1144_s1, [#allocation5]  }
  0x17   :  { %s1117_s24 = scalar_lea.vmem %s46_s23, 16  ;;  %p1122_p11 = scmp.lt.s32.totalorder %s46_s23, %s46_s23 }
  0x18   :  { %p1118_p10 = scmp.ne.s32.totalorder %s46_s23, %s1117_s24  ;;  %p1123_p12 = scmp.lt.s32.totalorder %s1117_s24, %s1117_s24 }
  0x1a   :  { %p1124_p13 = por %p1123_p12, %p1122_p11 }
  0x1c   :  { %p1125_p0 = pnand %p1124_p13, %p1118_p10 }
  0x1e   :  { %1128 = shalt.err (!%p1125_p0)
}
  0x1f   :  { %s1145_s25 = smov [#allocation8]  }
  0x20   :  { %48 = dma.vmem_to_smem %s46_s23, 16, %s1145_s25, [#allocation7]  }
  0x21   :  { %1137 = dma.done.wait [#allocation5], 16  }
  0x22   :  { %1138 = vsyncadd [#allocation5], 4294967280 }
  0x23   :  { %1139 = dma.done.wait [#allocation7], 32  }
  0x24   :  { %1140 = vsyncadd [#allocation7], 4294967264 }
  0x25   :  { %70 = sfence }
  0x26   :  { %v845_v0 = vld [vmem:[%s1872_s4] sm:$0xff]  ;;  %vm837_vm0 = vcmask 785408   ;;  %s1229_s4 = sld [smem:[#allocation6]]  ;;  %v875_v11 = vlaneseq  ;;  %vm881_vm3 = vcmask 23552  }
  0x27   :  { %v1085_v1 = vld [vmem:[%s1875_s7] ss:$0 sm:$0xff]  ;;  %s967_s20 = sld [smem:[#allocation3 + $0x2]] }
  0x28   :  { %v860_v2 = vld [vmem:[%s1873_s5] sm:$0xff]  ;;  %v853_v3 = vmul.f32 %v1085_v1, %v845_v0  ;;  %s72_s5 = sld [smem:[#allocation3]]  ;;  %v876_v18 = vand.u32 127, %v875_v11 }
  0x29   :  { %v1087_v4 = vld [vmem:[%s1876_s8] ss:$0 sm:$0xff]  ;;  %s969_s28 = sld [smem:[#allocation3 + $0x3]] }
  0x2a   :  { %v828_v5 = vld [vmem:[%s1871_s3] sm:$0xff]  ;;  %854 = vadd.xlane.f32.xlu0 %v853_v3  ;;  %v868_v8 = vmul.f32 %v1087_v4, %v860_v2  ;;  %s966_s3 = sld [smem:[#allocation3 + $0x1]]  ;;  %vm878_vm1 = vcmp.eq.s32.totalorder %v876_v18, 1  ;;  %vm877_vm2 = vcmp.eq.s32.totalorder %v876_v18, 0 }
  0x2b   :  { %v1084_v6 = vld [vmem:[%s1874_s6] ss:$0 sm:$0xff]  ;;  %s971_s15 = sld [smem:[#allocation3 + $0x4]] }
  0x2c   :  { %v836_v7 = vmul.f32 %v1084_v6, %v828_v5  ;;  %p73_p1 = scmp.gt.s32.totalorder %s1229_s4, 0  ;;  %p84_p2 = scmp.gt.s32.totalorder %s1229_s4, 1 }
  0x2d   :  { %p96_p3 = scmp.gt.s32.totalorder %s1229_s4, 2  ;;  %s92_s26 = smul.f32 0.3, %s967_s20 }
  0x2e   :  { %v838_v9 = vsel %vm837_vm0, %v836_v7, 0.0  ;;  %869 = vadd.xlane.f32.xlu0 %v868_v8  ;;  %s74_s6 = scalar_select %p73_p1, 0, 63 }
  0x2f   :  { %839 = vadd.xlane.f32.xlu1 %v838_v9  ;;  %s78_s7 = scalar_select %p73_p1, 1, 0 }
  0x30   :  { %s75_s8 = scalar_lea.smem [#allocation2], %s74_s6  ;;  %s80_s19 = smul.f32 0.3, %s966_s3 }
  0x31   :  { %76 = sst [smem:[%s75_s8]] %s72_s5  ;;  %s1880_s5 = smov (!%p73_p1, %s72_s5), 0.0 }
  0x32   :  { %s81_s17 = sld [smem:[#allocation2]]  ;;  %p108_p4 = scmp.gt.s32.totalorder %s1229_s4, 3 }
  0x33   :  { %s85_s18 = scalar_select %p84_p2, %s78_s7, 63 }
  0x34   :  { %s89_s1 = scalar_select %p84_p2, 1, 0 }
  0x35   :  { %s86_s22 = scalar_lea.smem [#allocation2], %s85_s18  ;;  %s104_s14 = smul.f32 0.3, %s969_s28 }
  0x36   :  { %s90_s23 = sadd.s32 %s89_s1, %s78_s7  ;;  %p120_p5 = scmp.gt.s32.totalorder %s1229_s4, 4 }
  0x37   :  { %s97_s25 = scalar_select %p96_p3, %s90_s23, 63 }
  0x38   :  { %s82_s21 = smul.f32 0.7, %s81_s17  ;;  %s1255_s3 = sld [smem:[#allocation3 + $0x5]] }
  0x39   :  { %s101_s27 = scalar_select %p96_p3, 1, 0 }
  0x3a   :  { %s83_s0 = sadd.f32 %s82_s21, %s80_s19  ;;  %s98_s30 = scalar_lea.smem [#allocation2], %s97_s25 }
  0x3b   :  { %s102_s11 = sadd.s32 %s101_s27, %s90_s23  ;;  %p132_p6 = scmp.gt.s32.totalorder %s1229_s4, 5 }
  0x3c   :  { %87 = sst [smem:[%s86_s22]] %s83_s0  ;;  %s1882_s0 = smov (!%p84_p2, %s83_s0), %s1880_s5 }
  0x3d   :  { %s968_s24 = sld [smem:[#allocation2 + $0x1]]  ;;  %s116_s21 = smul.f32 0.3, %s971_s15 }
  0x3e   :  { %s109_s13 = scalar_select %p108_p4, %s102_s11, 63 }
  0x3f   :  { %s113_s16 = scalar_select %p108_p4, 1, 0 }
  0x40   :  { %s125_s6 = scalar_select %p120_p5, 1, 0 }
  0x41   :  { %s1262_s8 = sld [smem:[#allocation3 + $0x6]]  ;;  %s110_s17 = scalar_lea.smem [#allocation2], %s109_s13 }
  0x42   :  { %s114_s18 = sadd.s32 %s113_s16, %s102_s11  ;;  %s1265_s20 = sld [smem:[#allocation6 + $0x1]] }
  0x43   :  { %s94_s2 = smul.f32 0.7, %s968_s24  ;;  %s126_s19 = sadd.s32 %s125_s6, %s114_s18 }
  0x44   :  { %s1884_s18 = smov (!%p120_p5, %s114_s18), 63  ;;  %p144_p7 = scmp.gt.s32.totalorder %s1229_s4, 6 }
  0x45   :  { %s1246_s29 = sadd.f32 %s94_s2, %s92_s26  ;;  %p156_p9 = scmp.gt.s32.totalorder %s1229_s4, 7 }
  0x46   :  { %s1271_s22 = scalar_select %p132_p6, %s126_s19, 63 }
  0x47   :  { %99 = sst [smem:[%s98_s30]] %s1246_s29  ;;  %s122_s30 = scalar_lea.smem [#allocation2], %s1884_s18 }
  0x48   :  { %s970_s12 = sld [smem:[#allocation2 + $0x2]]  ;;  %p167_p8 = scmp.gt.s32.totalorder %s1265_s20, 0 }
  0x49   :  { %s1274_s23 = sld [smem:[#allocation3 + $0x8]]  ;;  %s128_s11 = smul.f32 0.3, %s1255_s3 }
  0x4a   :  { %s137_s24 = scalar_select %p132_p6, 1, 0 }
  0x4b   :  { %s149_s25 = scalar_select %p144_p7, 1, 0 }
  0x4c   :  { %s1280_s27 = sld [smem:[#allocation3 + $0x7]]  ;;  %s1886_s29 = smov (!%p96_p3, %s1246_s29), %s1882_s0 }
  0x4d   :  { %s138_s13 = sadd.s32 %s137_s24, %s126_s19  ;;  %p179_p10 = scmp.gt.s32.totalorder %s1265_s20, 1 }
  0x4e   :  { %s106_s5 = smul.f32 0.7, %s970_s12  ;;  %p191_p11 = scmp.gt.s32.totalorder %s1265_s20, 2 }
  0x4f   :  { %s1287_s28 = scalar_select %p167_p8, %s1274_s23, 0.0 }
  0x50   :  { %s1259_s7 = sadd.f32 %s106_s5, %s104_s14  ;;  %s150_s14 = sadd.s32 %s149_s25, %s138_s13 }
  0x51   :  { %s161_s15 = scalar_select %p156_p9, 1, 0 }
  0x52   :  { %111 = sst [smem:[%s110_s17]] %s1259_s7  ;;  %s1888_s7 = smov (!%p108_p4, %s1259_s7), %s1886_s29 }
  0x53   :  { %s972_s1 = sld [smem:[#allocation2 + $0x3]]  ;;  %s1890_s13 = smov (!%p144_p7, %s138_s13), 63 }
  0x54   :  { %s1303_s16 = scalar_select %p156_p9, %s150_s14, 63 }
  0x55   :  { %s162_s5 = sadd.s32 %s161_s15, %s150_s14  ;;  %s134_s17 = scalar_lea.smem [#allocation2], %s1271_s22 }
  0x56   :  { %s1309_s6 = scalar_select %p167_p8, %s162_s5, 63 }
  0x57   :  { %s140_s29 = smul.f32 0.3, %s1262_s8  ;;  %p203_p12 = scmp.gt.s32.totalorder %s1265_s20, 3 }
  0x58   :  { %s152_s19 = smul.f32 0.3, %s1280_s27  ;;  %p215_p13 = scmp.gt.s32.totalorder %s1265_s20, 4 }
  0x59   :  { %s118_s26 = smul.f32 0.7, %s972_s1  ;;  %p227_p0 = scmp.gt.s32.totalorder %s1265_s20, 5 }
  0x5a   :  { %s196_s1 = scalar_select %p191_p11, 1, 0 }
  0x5b   :  { %s119_s2 = sadd.f32 %s118_s26, %s116_s21  ;;  %p239_p1 = scmp.gt.s32.totalorder %s1265_s20, 6 }
  0x5c   :  { %s172_s21 = scalar_select %p167_p8, 1, 0 }
  0x5d   :  { %123 = sst [smem:[%s122_s30]] %s119_s2  ;;  %s1892_s2 = smov (!%p120_p5, %s119_s2), %s1888_s7 }
  0x5e   :  { %s974_s12 = sld [smem:[#allocation2 + $0x4]]  ;;  %s173_s8 = sadd.s32 %s172_s21, %s162_s5 }
  0x5f   :  { %s184_s7 = scalar_select %p179_p10, 1, 0 }
  0x60   :  { %s208_s24 = scalar_select %p203_p12, 1, 0 }
  0x61   :  { %s1327_s26 = sadd.s32 %s184_s7, %s173_s8  ;;  %s1898_s8 = smov (!%p179_p10, %s173_s8), 63 }
  0x62   :  { %s1332_s30 = sadd.s32 %s196_s1, %s1327_s26  ;;  %s158_s21 = scalar_lea.smem [#allocation2], %s1303_s16 }
  0x63   :  { %s220_s14 = scalar_select %p215_p13, 1, 0 }
  0x64   :  { %s130_s0 = smul.f32 0.7, %s974_s12  ;;  %s1337_s12 = sadd.s32 %s208_s24, %s1332_s30 }
  0x65   :  { %s221_s15 = sadd.s32 %s220_s14, %s1337_s12  ;;  %s169_s7 = scalar_lea.smem [#allocation2], %s1309_s6 }
  0x66   :  { %s131_s3 = sadd.f32 %s130_s0, %s128_s11  ;;  %p251_p2 = scmp.gt.s32.totalorder %s1265_s20, 7 }
  0x67   :  { %s1347_s0 = scalar_select %p227_p0, %s221_s15, 63 }
  0x68   :  { %135 = sst [smem:[%s134_s17]] %s131_s3  ;;  %s1894_s3 = smov (!%p132_p6, %s131_s3), %s1892_s2 }
  0x69   :  { %s976_s18 = sld [smem:[#allocation2 + $0x5]]  ;;  %s146_s2 = scalar_lea.smem [#allocation2], %s1890_s13 }
  0x6a   :  { %s232_s13 = scalar_select %p227_p0, 1, 0 }
  0x6b   :  { %s981_s17 = sld [smem:[#allocation3 + $0x9]]  ;;  %s1904_s26 = smov (!%p191_p11, %s1327_s26), 63 }
  0x6c   :  { %s233_s5 = sadd.s32 %s232_s13, %s221_s15  ;;  %s984_s13 = sld [smem:[#allocation3 + $0xb]] }
  0x6d   :  { %s256_s27 = scalar_select %p251_p2, 1, 0 }
  0x6e   :  { %s1906_s30 = smov (!%p203_p12, %s1332_s30), 63  ;;  %s1908_s12 = smov (!%p215_p13, %s1337_s12), 63 }
  0x6f   :  { %s142_s22 = smul.f32 0.7, %s976_s18 }
  0x71   :  { %s143_s25 = sadd.f32 %s142_s22, %s140_s29 }
  0x72   :  { %s1351_s29 = scalar_select %p239_p1, %s233_s5, 63 }
  0x73   :  { %147 = sst [smem:[%s146_s2]] %s143_s25  ;;  %s1896_s25 = smov (!%p144_p7, %s143_s25), %s1894_s3 }
  0x74   :  { %s978_s11 = sld [smem:[#allocation2 + $0x6]]  ;;  %s181_s2 = scalar_lea.smem [#allocation2], %s1898_s8 }
  0x75   :  { %s244_s22 = scalar_select %p239_p1, 1, 0 }
  0x77   :  { %s245_s24 = sadd.s32 %s244_s22, %s233_s5  ;;  %s1381_s5 = sld [smem:[#allocation6 + $0x2]] }
  0x78   :  { %s1369_s4 = scalar_select %p251_p2, %s245_s24, 63 }
  0x79   :  { %s1371_s16 = sadd.s32 %s256_s27, %s245_s24 }
  0x7a   :  { %s154_s3 = smul.f32 0.7, %s978_s11 }
  0x7c   :  { %s155_s18 = sadd.f32 %s154_s3, %s152_s19  ;;  %s175_s19 = smul.f32 0.3, %s981_s17 }
  0x7d   :  { %s199_s17 = smul.f32 0.3, %s984_s13  ;;  %p262_p3 = scmp.gt.s32.totalorder %s1381_s5, 0 }
  0x7e   :  { %159 = sst [smem:[%s158_s21]] %s155_s18  ;;  %s1900_s18 = smov (!%p156_p9, %s155_s18), %s1896_s25 }
  0x7f   :  { %170 = sst [smem:[%s169_s7]] %s1274_s23  ;;  %p274_p4 = scmp.gt.s32.totalorder %s1381_s5, 1 }
  0x80   :  { %164 = sst [smem:[#allocation9]] %s1900_s18  ;;  %p286_p5 = scmp.gt.s32.totalorder %s1381_s5, 2 }
  0x81   :  { %s176_s1 = sld [smem:[#allocation2]]  ;;  %p298_p6 = scmp.gt.s32.totalorder %s1381_s5, 3 }
  0x82   :  { %s982_s23 = sld [smem:[#allocation3 + $0xa]]  ;;  %p310_p7 = scmp.gt.s32.totalorder %s1381_s5, 4 }
  0x83   :  { %s1389_s18 = sld [smem:[#allocation3 + $0xc]]  ;;  %p322_p8 = scmp.gt.s32.totalorder %s1381_s5, 5 }
  0x84   :  { %s267_s21 = scalar_select %p262_p3, 1, 0 }
  0x85   :  { %s291_s27 = scalar_select %p286_p5, 1, 0 }
  0x86   :  { %s1407_s22 = sadd.s32 %s267_s21, %s1371_s16  ;;  %s988_s13 = sld [smem:[#allocation3 + $0xd]] }
  0x87   :  { %s177_s6 = smul.f32 0.7, %s176_s1  ;;  %p334_p9 = scmp.gt.s32.totalorder %s1381_s5, 6 }
  0x88   :  { %s187_s14 = smul.f32 0.3, %s982_s23  ;;  %s217_s21 = scalar_lea.smem [#allocation2], %s1908_s12 }
  0x89   :  { %s178_s25 = sadd.f32 %s177_s6, %s175_s19  ;;  %s205_s19 = scalar_lea.smem [#allocation2], %s1906_s30 }
  0x8a   :  { %s303_s24 = scalar_select %p298_p6, 1, 0 }
  0x8b   :  { %182 = sst [smem:[%s181_s2]] %s178_s25  ;;  %s1902_s25 = smov (!%p179_p10, %s178_s25), %s1287_s28 }
  0x8c   :  { %s983_s11 = sld [smem:[#allocation2 + $0x1]]  ;;  %s193_s28 = scalar_lea.smem [#allocation2], %s1904_s26 }
  0x8d   :  { %s279_s26 = scalar_select %p274_p4, 1, 0 }
  0x8e   :  { %p346_p10 = scmp.gt.s32.totalorder %s1381_s5, 7  ;;  %s1920_s16 = smov (!%p262_p3, %s1371_s16), 63 }
  0x8f   :  { %s1416_s23 = sadd.s32 %s279_s26, %s1407_s22  ;;  %s1924_s22 = smov (!%p274_p4, %s1407_s22), 63 }
  0x90   :  { %s1419_s2 = sadd.s32 %s291_s27, %s1416_s23  ;;  %s1930_s23 = smov (!%p286_p5, %s1416_s23), 63 }
  0x91   :  { %s1426_s30 = sadd.s32 %s303_s24, %s1419_s2  ;;  %s1932_s2 = smov (!%p298_p6, %s1419_s2), 63 }
  0x92   :  { %s189_s15 = smul.f32 0.7, %s983_s11 }
  0x93   :  { %s315_s11 = scalar_select %p310_p7, 1, 0 }
  0x94   :  { %s1383_s8 = sadd.f32 %s189_s15, %s187_s14  ;;  %s211_s14 = smul.f32 0.3, %s1389_s18 }
  0x95   :  { %s316_s15 = sadd.s32 %s315_s11, %s1426_s30  ;;  %s1934_s30 = smov (!%p310_p7, %s1426_s30), 63 }
  0x96   :  { %194 = sst [smem:[%s193_s28]] %s1383_s8  ;;  %s1910_s8 = smov (!%p191_p11, %s1383_s8), %s1902_s25 }
  0x97   :  { %s985_s3 = sld [smem:[#allocation2 + $0x2]]  ;;  %s223_s25 = smul.f32 0.3, %s988_s13 }
  0x98   :  { %s1431_s28 = scalar_select %p322_p8, %s316_s15, 63 }
  0x99   :  { %s327_s18 = scalar_select %p322_p8, 1, 0 }
  0x9a   :  { %s339_s24 = scalar_select %p334_p9, 1, 0 }
  0x9b   :  { %s328_s27 = sadd.s32 %s327_s18, %s316_s15 }
  0x9c   :  { %s351_s15 = scalar_select %p346_p10, 1, 0 }
  0x9d   :  { %s201_s7 = smul.f32 0.7, %s985_s3 }
  0x9f   :  { %s1404_s1 = sadd.f32 %s201_s7, %s199_s17 }
  0xa0   :  { %s990_s7 = sld [smem:[#allocation3 + $0xe]] }
  0xa1   :  { %206 = sst [smem:[%s205_s19]] %s1404_s1  ;;  %s1912_s1 = smov (!%p203_p12, %s1404_s1), %s1910_s8 }
  0xa2   :  { %s987_s6 = sld [smem:[#allocation2 + $0x3]] }
  0xa3   :  { %s1444_s19 = scalar_select %p334_p9, %s328_s27, 63 }
  0xa6   :  { %s235_s18 = smul.f32 0.3, %s990_s7  ;;  %s253_s7 = scalar_lea.smem [#allocation2], %s1369_s4 }
  0xa7   :  { %s276_s4 = scalar_lea.smem [#allocation2], %s1924_s22 }
  0xa8   :  { %s213_s3 = smul.f32 0.7, %s987_s6  ;;  %s340_s6 = sadd.s32 %s339_s24, %s328_s27 }
  0xa9   :  { %s1453_s11 = scalar_select %p346_p10, %s340_s6, 63 }
  0xaa   :  { %s214_s17 = sadd.f32 %s213_s3, %s211_s14  ;;  %s229_s3 = scalar_lea.smem [#allocation2], %s1347_s0 }
  0xab   :  { %s1462_s13 = sadd.s32 %s351_s15, %s340_s6  ;;  %s992_s27 = sld [smem:[#allocation3 + $0xf]] }
  0xac   :  { %218 = sst [smem:[%s217_s21]] %s214_s17  ;;  %s1914_s17 = smov (!%p215_p13, %s214_s17), %s1912_s1 }
  0xad   :  { %s989_s26 = sld [smem:[#allocation2 + $0x4]]  ;;  %s241_s24 = scalar_lea.smem [#allocation2], %s1351_s29 }
  0xae   :  { %s264_s29 = scalar_lea.smem [#allocation2], %s1920_s16 }
  0xb1   :  { %s247_s0 = smul.f32 0.3, %s992_s27  ;;  %s999_s27 = sld [smem:[#allocation3 + $0x13]] }
  0xb3   :  { %s225_s12 = smul.f32 0.7, %s989_s26  ;;  %v855_v10 = vpop.xlane.xlu0 %854 }
  0xb5   :  { %s226_s14 = sadd.f32 %s225_s12, %s223_s25 }
  0xb6   :  { %s995_s25 = sld [smem:[#allocation3 + $0x10]] }
  0xb7   :  { %230 = sst [smem:[%s229_s3]] %s226_s14  ;;  %s1916_s14 = smov (!%p227_p0, %s226_s14), %s1914_s17  ;;  %v870_v15 = vpop.xlane.xlu0 %869 }
  0xb8   :  { %s991_s8 = sld [smem:[#allocation2 + $0x5]]  ;;  %v840_v12 = vpop.xlane.xlu1 %839 }
  0xb9   :  { %s996_s12 = sld [smem:[#allocation3 + $0x11]] }
  0xbe   :  { %s237_s21 = smul.f32 0.7, %s991_s8  ;;  %s997_s8 = sld [smem:[#allocation3 + $0x12]] }
  0xbf   :  { %s270_s15 = smul.f32 0.3, %s996_s12 }
  0xc0   :  { %s238_s26 = sadd.f32 %s237_s21, %s235_s18 }
  0xc2   :  { %242 = sst [smem:[%s241_s24]] %s238_s26  ;;  %s1918_s26 = smov (!%p239_p1, %s238_s26), %s1916_s14 }
  0xc3   :  { %s993_s1 = sld [smem:[#allocation2 + $0x6]]  ;;  %s288_s24 = scalar_lea.smem [#allocation2], %s1930_s23 }
  0xc4   :  { %s282_s16 = smul.f32 0.3, %s997_s8  ;;  %s1005_s8 = sld [smem:[#allocation3 + $0x16]] }
  0xc9   :  { %s249_s17 = smul.f32 0.7, %s993_s1 }
  0xcb   :  { %s250_s6 = sadd.f32 %s249_s17, %s247_s0  ;;  %s294_s0 = smul.f32 0.3, %s999_s27 }
  0xcc   :  { %s1001_s17 = sld [smem:[#allocation3 + $0x14]] }
  0xcd   :  { %254 = sst [smem:[%s253_s7]] %s250_s6  ;;  %s1922_s6 = smov (!%p251_p2, %s250_s6), %s1918_s26 }
  0xce   :  { %265 = sst [smem:[%s264_s29]] %s995_s25  ;;  %s1926_s25 = smov (!%p262_p3, %s995_s25), 0.0 }
  0xcf   :  { %259 = sst [smem:[#allocation9 + $0x1]] %s1922_s6  ;;  %s300_s6 = scalar_lea.smem [#allocation2], %s1932_s2 }
  0xd0   :  { %s271_s14 = sld [smem:[#allocation2]] }
  0xd1   :  { %s1003_s29 = sld [smem:[#allocation3 + $0x15]] }
  0xd2   :  { %s306_s7 = smul.f32 0.3, %s1001_s17  ;;  %s1498_s27 = sld [smem:[#allocation6 + $0x3]] }
  0xd6   :  { %s272_s3 = smul.f32 0.7, %s271_s14 }
  0xd7   :  { %s318_s2 = smul.f32 0.3, %s1003_s29 }
  0xd8   :  { %s273_s18 = sadd.f32 %s272_s3, %s270_s15  ;;  %s312_s15 = scalar_lea.smem [#allocation2], %s1934_s30 }
  0xd9   :  { %p357_p11 = scmp.gt.s32.totalorder %s1498_s27, 0  ;;  %p369_p12 = scmp.gt.s32.totalorder %s1498_s27, 1 }
  0xda   :  { %277 = sst [smem:[%s276_s4]] %s273_s18  ;;  %s1928_s18 = smov (!%p274_p4, %s273_s18), %s1926_s25 }
  0xdb   :  { %s998_s20 = sld [smem:[#allocation2 + $0x1]]  ;;  %p381_p13 = scmp.gt.s32.totalorder %s1498_s27, 2 }
  0xdc   :  { %s358_s17 = scalar_select %p357_p11, %s1462_s13, 63 }
  0xdd   :  { %p393_p0 = scmp.gt.s32.totalorder %s1498_s27, 3  ;;  %p405_p1 = scmp.gt.s32.totalorder %s1498_s27, 4 }
  0xde   :  { %p417_p2 = scmp.gt.s32.totalorder %s1498_s27, 5  ;;  %p429_p3 = scmp.gt.s32.totalorder %s1498_s27, 6 }
  0xdf   :  { %p441_p4 = scmp.gt.s32.totalorder %s1498_s27, 7 }
  0xe1   :  { %s284_s21 = smul.f32 0.7, %s998_s20 }
  0xe3   :  { %s285_s26 = sadd.f32 %s284_s21, %s282_s16  ;;  %s324_s16 = scalar_lea.smem [#allocation2], %s1431_s28 }
  0xe4   :  { %s330_s21 = smul.f32 0.3, %s1005_s8 }
  0xe5   :  { %289 = sst [smem:[%s288_s24]] %s285_s26  ;;  %s1936_s26 = smov (!%p286_p5, %s285_s26), %s1928_s18 }
  0xe6   :  { %s1000_s1 = sld [smem:[#allocation2 + $0x2]] }
  0xec   :  { %s296_s22 = smul.f32 0.7, %s1000_s1  ;;  %s336_s1 = scalar_lea.smem [#allocation2], %s1444_s19 }
  0xed   :  { %s359_s19 = scalar_lea.smem [#allocation2], %s358_s17 }
  0xee   :  { %s297_s25 = sadd.f32 %s296_s22, %s294_s0 }
  0xef   :  { %s1010_s22 = sld [smem:[#allocation3 + $0x18]] }
  0xf0   :  { %301 = sst [smem:[%s300_s6]] %s297_s25  ;;  %s1938_s25 = smov (!%p298_p6, %s297_s25), %s1936_s26 }
  0xf1   :  { %s1002_s12 = sld [smem:[#allocation2 + $0x3]] }
  0xf2   :  { %s1007_s26 = sld [smem:[#allocation3 + $0x17]] }
  0xf3   :  { %s1011_s6 = sld [smem:[#allocation3 + $0x19]] }
  0xf7   :  { %s308_s23 = smul.f32 0.7, %s1002_s12 }
  0xf8   :  { %s342_s0 = smul.f32 0.3, %s1007_s26  ;;  %s1014_s26 = sld [smem:[#allocation3 + $0x1b]] }
  0xf9   :  { %s309_s14 = sadd.f32 %s308_s23, %s306_s7  ;;  %s348_s23 = scalar_lea.smem [#allocation2], %s1453_s11 }
  0xfa   :  { %s362_s7 = scalar_select %p357_p11, 1, 0 }
  0xfb   :  { %313 = sst [smem:[%s312_s15]] %s309_s14  ;;  %s1940_s14 = smov (!%p310_p7, %s309_s14), %s1938_s25 }
  0xfc   :  { %s1004_s3 = sld [smem:[#allocation2 + $0x4]]  ;;  %s363_s29 = sadd.s32 %s362_s7, %s1462_s13 }
  0xfd   :  { %s370_s15 = scalar_select %p369_p12, %s363_s29, 63 }
  0xfe   :  { %s1012_s11 = sld [smem:[#allocation3 + $0x1a]]  ;;  %s389_s17 = smul.f32 0.3, %s1014_s26 }
  0xff   :  { %s371_s5 = scalar_lea.smem [#allocation2], %s370_s15 }
 0x102   :  { %s320_s4 = smul.f32 0.7, %s1004_s3 }
 0x103   :  { %s365_s3 = smul.f32 0.3, %s1011_s6  ;;  %s1016_s6 = sld [smem:[#allocation3 + $0x1c]] }
 0x104   :  { %s321_s20 = sadd.f32 %s320_s4, %s318_s2 }
 0x105   :  { %s374_s2 = scalar_select %p369_p12, 1, 0 }
 0x106   :  { %325 = sst [smem:[%s324_s16]] %s321_s20  ;;  %s1942_s20 = smov (!%p322_p8, %s321_s20), %s1940_s14 }
 0x107   :  { %s1006_s30 = sld [smem:[#allocation2 + $0x5]] }
 0x109   :  { %s401_s15 = smul.f32 0.3, %s1016_s6 }
 0x10d   :  { %s332_s18 = smul.f32 0.7, %s1006_s30 }
 0x10e   :  { %s377_s30 = smul.f32 0.3, %s1012_s11 }
 0x10f   :  { %s333_s24 = sadd.f32 %s332_s18, %s330_s21 }
 0x110   :  { %s386_s21 = scalar_select %p381_p13, 1, 0 }
 0x111   :  { %337 = sst [smem:[%s336_s1]] %s333_s24  ;;  %s1944_s24 = smov (!%p334_p9, %s333_s24), %s1942_s20 }
 0x112   :  { %s1008_s28 = sld [smem:[#allocation2 + $0x6]]  ;;  %s375_s20 = sadd.s32 %s374_s2, %s363_s29 }
 0x113   :  { %s382_s13 = scalar_select %p381_p13, %s375_s20, 63 }
 0x115   :  { %s383_s1 = scalar_lea.smem [#allocation2], %s382_s13 }
 0x118   :  { %s344_s25 = smul.f32 0.7, %s1008_s28  ;;  %s387_s28 = sadd.s32 %s386_s21, %s375_s20 }
 0x119   :  { %s422_s21 = scalar_select %p417_p2, 1, 0 }
 0x11a   :  { %s345_s12 = sadd.f32 %s344_s25, %s342_s0 }
 0x11c   :  { %349 = sst [smem:[%s348_s23]] %s345_s12  ;;  %s1946_s12 = smov (!%p346_p10, %s345_s12), %s1944_s24 }
 0x11d   :  { %360 = sst [smem:[%s359_s19]] %s1010_s22  ;;  %s1948_s22 = smov (!%p357_p11, %s1010_s22), 0.0 }
 0x11e   :  { %354 = sst [smem:[#allocation9 + $0x2]] %s1946_s12 }
 0x11f   :  { %s366_s14 = sld [smem:[#allocation2]] }
 0x120   :  { %s398_s12 = scalar_select %p393_p0, 1, 0 }
 0x122   :  { %s399_s19 = sadd.s32 %s398_s12, %s387_s28 }
 0x125   :  { %s367_s8 = smul.f32 0.7, %s366_s14 }
 0x126   :  { %s406_s14 = scalar_select %p405_p1, %s399_s19, 63 }
 0x127   :  { %s368_s4 = sadd.f32 %s367_s8, %s365_s3 }
 0x128   :  { %s410_s3 = scalar_select %p405_p1, 1, 0 }
 0x129   :  { %372 = sst [smem:[%s371_s5]] %s368_s4  ;;  %s1950_s4 = smov (!%p369_p12, %s368_s4), %s1948_s22 }
 0x12a   :  { %s1013_s16 = sld [smem:[#allocation2 + $0x1]]  ;;  %s407_s5 = scalar_lea.smem [#allocation2], %s406_s14 }
 0x12b   :  { %s394_s22 = scalar_select %p393_p0, %s387_s28, 63 }
 0x12c   :  { %s1018_s8 = sld [smem:[#allocation3 + $0x1d]]  ;;  %s411_s20 = sadd.s32 %s410_s3, %s399_s19 }
 0x12d   :  { %s395_s23 = scalar_lea.smem [#allocation2], %s394_s22  ;;  %s423_s28 = sadd.s32 %s422_s21, %s411_s20 }
 0x12e   :  { %s1022_s14 = sld [smem:[#allocation3 + $0x1f]] }
 0x12f   :  { %s446_s3 = scalar_select %p441_p4, 1, 0 }
 0x130   :  { %s379_s18 = smul.f32 0.7, %s1013_s16 }
 0x132   :  { %s1523_s24 = sadd.f32 %s379_s18, %s377_s30  ;;  %s413_s13 = smul.f32 0.3, %s1018_s8 }
 0x133   :  { %s418_s30 = scalar_select %p417_p2, %s411_s20, 63 }
 0x134   :  { %384 = sst [smem:[%s383_s1]] %s1523_s24  ;;  %s1952_s24 = smov (!%p381_p13, %s1523_s24), %s1950_s4 }
 0x135   :  { %s1015_s0 = sld [smem:[#allocation2 + $0x2]]  ;;  %s419_s22 = scalar_lea.smem [#allocation2], %s418_s30 }
 0x136   :  { %s1020_s18 = sld [smem:[#allocation3 + $0x1e]] }
 0x137   :  { %s1025_s20 = sld [smem:[#allocation3 + $0x20]] }
 0x13b   :  { %s391_s25 = smul.f32 0.7, %s1015_s0 }
 0x13c   :  { %s434_s0 = scalar_select %p429_p3, 1, 0 }
 0x13d   :  { %s1531_s7 = sadd.f32 %s391_s25, %s389_s17  ;;  %s425_s6 = smul.f32 0.3, %s1020_s18 }
 0x13e   :  { %s430_s17 = scalar_select %p429_p3, %s423_s28, 63 }
 0x13f   :  { %396 = sst [smem:[%s395_s23]] %s1531_s7  ;;  %s435_s12 = sadd.s32 %s434_s0, %s423_s28 }
 0x140   :  { %s1017_s29 = sld [smem:[#allocation2 + $0x3]]  ;;  %s1954_s7 = smov (!%p393_p0, %s1531_s7), %s1952_s24 }
 0x141   :  { %s1557_s23 = sld [smem:[#allocation6 + $0x4]]  ;;  %s447_s8 = sadd.s32 %s446_s3, %s435_s12 }
 0x142   :  { %s442_s19 = scalar_select %p441_p4, %s435_s12, 63 }
 0x143   :  { %s1029_s3 = sld [smem:[#allocation3 + $0x23]] }
 0x144   :  { %s443_s21 = scalar_lea.smem [#allocation2], %s442_s19 }
 0x146   :  { %s403_s2 = smul.f32 0.7, %s1017_s29 }
 0x147   :  { %p452_p5 = scmp.gt.s32.totalorder %s1557_s23, 0  ;;  %p464_p6 = scmp.gt.s32.totalorder %s1557_s23, 1 }
 0x148   :  { %s1539_s11 = sadd.f32 %s403_s2, %s401_s15  ;;  %s431_s2 = scalar_lea.smem [#allocation2], %s430_s17 }
 0x149   :  { %s457_s24 = scalar_select %p452_p5, 1, 0 }
 0x14a   :  { %408 = sst [smem:[%s407_s5]] %s1539_s11  ;;  %s1956_s11 = smov (!%p405_p1, %s1539_s11), %s1954_s7 }
 0x14b   :  { %s1019_s16 = sld [smem:[#allocation2 + $0x4]]  ;;  %s437_s5 = smul.f32 0.3, %s1022_s14 }
 0x14c   :  { %s1026_s7 = sld [smem:[#allocation3 + $0x21]]  ;;  %s458_s18 = sadd.s32 %s457_s24, %s447_s8 }
 0x14d   :  { %s465_s28 = scalar_select %p464_p6, %s458_s18, 63 }
 0x14e   :  { %s469_s17 = scalar_select %p464_p6, 1, 0 }
 0x14f   :  { %p476_p7 = scmp.gt.s32.totalorder %s1557_s23, 2  ;;  %p488_p8 = scmp.gt.s32.totalorder %s1557_s23, 3 }
 0x150   :  { %p500_p9 = scmp.gt.s32.totalorder %s1557_s23, 4  ;;  %p512_p10 = scmp.gt.s32.totalorder %s1557_s23, 5 }
 0x151   :  { %s415_s26 = smul.f32 0.7, %s1019_s16  ;;  %p524_p11 = scmp.gt.s32.totalorder %s1557_s23, 6 }
 0x152   :  { %s453_s16 = scalar_select %p452_p5, %s447_s8, 63 }
 0x153   :  { %s416_s1 = sadd.f32 %s415_s26, %s413_s13  ;;  %p536_p12 = scmp.gt.s32.totalorder %s1557_s23, 7 }
 0x154   :  { %s481_s14 = scalar_select %p476_p7, 1, 0 }
 0x155   :  { %420 = sst [smem:[%s419_s22]] %s416_s1  ;;  %s1958_s1 = smov (!%p417_p2, %s416_s1), %s1956_s11 }
 0x156   :  { %s1021_s25 = sld [smem:[#allocation2 + $0x5]]  ;;  %s454_s11 = scalar_lea.smem [#allocation2], %s453_s16 }
 0x157   :  { %s1027_s22 = sld [smem:[#allocation3 + $0x22]]  ;;  %s484_s16 = smul.f32 0.3, %s1029_s3 }
 0x158   :  { %s493_s24 = scalar_select %p488_p8, 1, 0 }
 0x15c   :  { %s427_s29 = smul.f32 0.7, %s1021_s25  ;;  %s466_s25 = scalar_lea.smem [#allocation2], %s465_s28 }
 0x15e   :  { %s428_s15 = sadd.f32 %s427_s29, %s425_s6  ;;  %s470_s6 = sadd.s32 %s469_s17, %s458_s18 }
 0x15f   :  { %s477_s19 = scalar_select %p476_p7, %s470_s6, 63 }
 0x160   :  { %432 = sst [smem:[%s431_s2]] %s428_s15  ;;  %s1960_s15 = smov (!%p429_p3, %s428_s15), %s1958_s1 }
 0x161   :  { %s1023_s4 = sld [smem:[#allocation2 + $0x6]]  ;;  %s460_s1 = smul.f32 0.3, %s1026_s7 }
 0x162   :  { %s472_s29 = smul.f32 0.3, %s1027_s22  ;;  %s482_s8 = sadd.s32 %s481_s14, %s470_s6 }
 0x163   :  { %s505_s22 = scalar_select %p500_p9, 1, 0 }
 0x164   :  { %s517_s14 = scalar_select %p512_p10, 1, 0 }
 0x167   :  { %s439_s13 = smul.f32 0.7, %s1023_s4  ;;  %s478_s4 = scalar_lea.smem [#allocation2], %s477_s19 }
 0x169   :  { %s440_s30 = sadd.f32 %s439_s13, %s437_s5 }
 0x16b   :  { %444 = sst [smem:[%s443_s21]] %s440_s30  ;;  %s1962_s30 = smov (!%p441_p4, %s440_s30), %s1960_s15 }
 0x16c   :  { %455 = sst [smem:[%s454_s11]] %s1025_s20  ;;  %s1964_s20 = smov (!%p452_p5, %s1025_s20), 0.0 }
 0x16d   :  { %449 = sst [smem:[#allocation9 + $0x3]] %s1962_s30  ;;  %s494_s11 = sadd.s32 %s493_s24, %s482_s8 }
 0x16e   :  { %s461_s26 = sld [smem:[#allocation2]]  ;;  %s506_s6 = sadd.s32 %s505_s22, %s494_s11 }
 0x16f   :  { %s1031_s30 = sld [smem:[#allocation3 + $0x24]] }
 0x174   :  { %s462_s0 = smul.f32 0.7, %s461_s26 }
 0x175   :  { %s501_s26 = scalar_select %p500_p9, %s494_s11, 63 }
 0x176   :  { %s463_s27 = sadd.f32 %s462_s0, %s460_s1  ;;  %s496_s28 = smul.f32 0.3, %s1031_s30 }
 0x177   :  { %s1033_s0 = sld [smem:[#allocation3 + $0x25]] }
 0x178   :  { %467 = sst [smem:[%s466_s25]] %s463_s27  ;;  %s1966_s27 = smov (!%p464_p6, %s463_s27), %s1964_s20 }
 0x179   :  { %s1028_s12 = sld [smem:[#allocation2 + $0x1]]  ;;  %s502_s25 = scalar_lea.smem [#allocation2], %s501_s26 }
 0x17a   :  { %s489_s20 = scalar_select %p488_p8, %s482_s8, 63 }
 0x17b   :  { %s518_s8 = sadd.s32 %s517_s14, %s506_s6  ;;  %s1037_s26 = sld [smem:[#allocation3 + $0x27]] }
 0x17c   :  { %s490_s21 = scalar_lea.smem [#allocation2], %s489_s20 }
 0x17d   :  { %s508_s19 = smul.f32 0.3, %s1033_s0 }
 0x17f   :  { %s474_s15 = smul.f32 0.7, %s1028_s12 }
 0x181   :  { %s1596_s2 = sadd.f32 %s474_s15, %s472_s29 }
 0x182   :  { %s513_s29 = scalar_select %p512_p10, %s506_s6, 63 }
 0x183   :  { %479 = sst [smem:[%s478_s4]] %s1596_s2  ;;  %s1968_s2 = smov (!%p476_p7, %s1596_s2), %s1966_s27 }
 0x184   :  { %s1030_s5 = sld [smem:[#allocation2 + $0x2]]  ;;  %s514_s20 = scalar_lea.smem [#allocation2], %s513_s29 }
 0x185   :  { %s1035_s15 = sld [smem:[#allocation3 + $0x26]] }
 0x186   :  { %s1040_s6 = sld [smem:[#allocation3 + $0x28]] }
 0x18a   :  { %s486_s13 = smul.f32 0.7, %s1030_s5 }
 0x18b   :  { %s529_s5 = scalar_select %p524_p11, 1, 0 }
 0x18c   :  { %s1604_s7 = sadd.f32 %s486_s13, %s484_s16  ;;  %s520_s13 = smul.f32 0.3, %s1035_s15 }
 0x18d   :  { %s525_s16 = scalar_select %p524_p11, %s518_s8, 63 }
 0x18e   :  { %491 = sst [smem:[%s490_s21]] %s1604_s7  ;;  %s530_s30 = sadd.s32 %s529_s5, %s518_s8 }
 0x18f   :  { %s1032_s18 = sld [smem:[#allocation2 + $0x3]]  ;;  %s1970_s7 = smov (!%p488_p8, %s1604_s7), %s1968_s2 }
 0x190   :  { %s1630_s21 = sld [smem:[#allocation6 + $0x5]]  ;;  %s526_s0 = scalar_lea.smem [#allocation2], %s525_s16 }
 0x191   :  { %s537_s11 = scalar_select %p536_p12, %s530_s30, 63 }
 0x193   :  { %s538_s14 = scalar_lea.smem [#allocation2], %s537_s11 }
 0x195   :  { %s498_s1 = smul.f32 0.7, %s1032_s18 }
 0x196   :  { %p547_p13 = scmp.gt.s32.totalorder %s1630_s21, 0  ;;  %p559_p0 = scmp.gt.s32.totalorder %s1630_s21, 1 }
 0x197   :  { %s1612_s17 = sadd.f32 %s498_s1, %s496_s28  ;;  %p571_p1 = scmp.gt.s32.totalorder %s1630_s21, 2 }
 0x198   :  { %s541_s1 = scalar_select %p536_p12, 1, 0 }
 0x199   :  { %503 = sst [smem:[%s502_s25]] %s1612_s17  ;;  %s1972_s17 = smov (!%p500_p9, %s1612_s17), %s1970_s7 }
 0x19a   :  { %s1034_s12 = sld [smem:[#allocation2 + $0x4]]  ;;  %s542_s22 = sadd.s32 %s541_s1, %s530_s30 }
 0x19b   :  { %s532_s25 = smul.f32 0.3, %s1037_s26  ;;  %s1041_s7 = sld [smem:[#allocation3 + $0x29]] }
 0x19c   :  { %s552_s2 = scalar_select %p547_p13, 1, 0 }
 0x19d   :  { %s564_s16 = scalar_select %p559_p0, 1, 0 }
 0x19e   :  { %s553_s15 = sadd.s32 %s552_s2, %s542_s22  ;;  %s1044_s1 = sld [smem:[#allocation3 + $0x2b]] }
 0x19f   :  { %s560_s8 = scalar_select %p559_p0, %s553_s15, 63 }
 0x1a0   :  { %s510_s3 = smul.f32 0.7, %s1034_s12  ;;  %p583_p2 = scmp.gt.s32.totalorder %s1630_s21, 3 }
 0x1a1   :  { %s548_s12 = scalar_select %p547_p13, %s542_s22, 63 }
 0x1a2   :  { %s511_s4 = sadd.f32 %s510_s3, %s508_s19  ;;  %p595_p3 = scmp.gt.s32.totalorder %s1630_s21, 4 }
 0x1a3   :  { %s576_s26 = scalar_select %p571_p1, 1, 0 }
 0x1a4   :  { %515 = sst [smem:[%s514_s20]] %s511_s4  ;;  %s1974_s4 = smov (!%p512_p10, %s511_s4), %s1972_s17 }
 0x1a5   :  { %s1036_s24 = sld [smem:[#allocation2 + $0x5]]  ;;  %s549_s17 = scalar_lea.smem [#allocation2], %s548_s12 }
 0x1a6   :  { %s1042_s20 = sld [smem:[#allocation3 + $0x2a]]  ;;  %s579_s12 = smul.f32 0.3, %s1044_s1 }
 0x1a7   :  { %s588_s2 = scalar_select %p583_p2, 1, 0 }
 0x1a8   :  { %p607_p4 = scmp.gt.s32.totalorder %s1630_s21, 5  ;;  %p619_p5 = scmp.gt.s32.totalorder %s1630_s21, 6 }
 0x1a9   :  { %p631_p6 = scmp.gt.s32.totalorder %s1630_s21, 7 }
 0x1ab   :  { %s522_s18 = smul.f32 0.7, %s1036_s24  ;;  %s561_s24 = scalar_lea.smem [#allocation2], %s560_s8 }
 0x1ad   :  { %s523_s28 = sadd.f32 %s522_s18, %s520_s13  ;;  %s565_s13 = sadd.s32 %s564_s16, %s553_s15 }
 0x1ae   :  { %s572_s11 = scalar_select %p571_p1, %s565_s13, 63 }
 0x1af   :  { %527 = sst [smem:[%s526_s0]] %s523_s28  ;;  %s1976_s28 = smov (!%p524_p11, %s523_s28), %s1974_s4 }
 0x1b0   :  { %s1038_s27 = sld [smem:[#allocation2 + $0x6]]  ;;  %s555_s4 = smul.f32 0.3, %s1041_s7 }
 0x1b1   :  { %s567_s18 = smul.f32 0.3, %s1042_s20  ;;  %s577_s22 = sadd.s32 %s576_s26, %s565_s13 }
 0x1b2   :  { %s600_s20 = scalar_select %p595_p3, 1, 0 }
 0x1b3   :  { %s612_s26 = scalar_select %p607_p4, 1, 0 }
 0x1b6   :  { %s534_s19 = smul.f32 0.7, %s1038_s27  ;;  %s573_s27 = scalar_lea.smem [#allocation2], %s572_s11 }
 0x1b8   :  { %s535_s29 = sadd.f32 %s534_s19, %s532_s25 }
 0x1ba   :  { %539 = sst [smem:[%s538_s14]] %s535_s29  ;;  %s1978_s29 = smov (!%p536_p12, %s535_s29), %s1976_s28 }
 0x1bb   :  { %550 = sst [smem:[%s549_s17]] %s1040_s6  ;;  %s1980_s6 = smov (!%p547_p13, %s1040_s6), 0.0 }
 0x1bc   :  { %544 = sst [smem:[#allocation9 + $0x4]] %s1978_s29  ;;  %s589_s17 = sadd.s32 %s588_s2, %s577_s22 }
 0x1bd   :  { %s556_s3 = sld [smem:[#allocation2]]  ;;  %s601_s13 = sadd.s32 %s600_s20, %s589_s17 }
 0x1be   :  { %s1046_s29 = sld [smem:[#allocation3 + $0x2c]] }
 0x1c3   :  { %s557_s5 = smul.f32 0.7, %s556_s3 }
 0x1c4   :  { %s596_s3 = scalar_select %p595_p3, %s589_s17, 63 }
 0x1c5   :  { %s558_s23 = sadd.f32 %s557_s5, %s555_s4  ;;  %s591_s8 = smul.f32 0.3, %s1046_s29 }
 0x1c6   :  { %s1048_s5 = sld [smem:[#allocation3 + $0x2d]] }
 0x1c7   :  { %562 = sst [smem:[%s561_s24]] %s558_s23  ;;  %s1982_s23 = smov (!%p559_p0, %s558_s23), %s1980_s6 }
 0x1c8   :  { %s1043_s30 = sld [smem:[#allocation2 + $0x1]]  ;;  %s597_s24 = scalar_lea.smem [#allocation2], %s596_s3 }
 0x1c9   :  { %s584_s6 = scalar_select %p583_p2, %s577_s22, 63 }
 0x1ca   :  { %s613_s22 = sadd.s32 %s612_s26, %s601_s13  ;;  %s1052_s3 = sld [smem:[#allocation3 + $0x2f]] }
 0x1cb   :  { %s585_s14 = scalar_lea.smem [#allocation2], %s584_s6 }
 0x1cc   :  { %s603_s11 = smul.f32 0.3, %s1048_s5 }
 0x1ce   :  { %s569_s28 = smul.f32 0.7, %s1043_s30 }
 0x1d0   :  { %s1669_s0 = sadd.f32 %s569_s28, %s567_s18 }
 0x1d1   :  { %s608_s18 = scalar_select %p607_p4, %s601_s13, 63 }
 0x1d2   :  { %574 = sst [smem:[%s573_s27]] %s1669_s0  ;;  %s1984_s0 = smov (!%p571_p1, %s1669_s0), %s1982_s23 }
 0x1d3   :  { %s1045_s25 = sld [smem:[#allocation2 + $0x2]]  ;;  %s609_s6 = scalar_lea.smem [#allocation2], %s608_s18 }
 0x1d4   :  { %s1050_s28 = sld [smem:[#allocation3 + $0x2e]] }
 0x1d5   :  { %s1055_s13 = sld [smem:[#allocation3 + $0x30]] }
 0x1d9   :  { %s581_s19 = smul.f32 0.7, %s1045_s25 }
 0x1da   :  { %s624_s25 = scalar_select %p619_p5, 1, 0 }
 0x1db   :  { %s1677_s7 = sadd.f32 %s581_s19, %s579_s12  ;;  %s615_s19 = smul.f32 0.3, %s1050_s28 }
 0x1dc   :  { %s620_s12 = scalar_select %p619_p5, %s613_s22, 63 }
 0x1dd   :  { %586 = sst [smem:[%s585_s14]] %s1677_s7  ;;  %s625_s29 = sadd.s32 %s624_s25, %s613_s22 }
 0x1de   :  { %s1047_s15 = sld [smem:[#allocation2 + $0x3]]  ;;  %s1986_s7 = smov (!%p583_p2, %s1677_s7), %s1984_s0 }
 0x1df   :  { %s1703_s14 = sld [smem:[#allocation6 + $0x6]]  ;;  %s621_s5 = scalar_lea.smem [#allocation2], %s620_s12 }
 0x1e0   :  { %s632_s17 = scalar_select %p631_p6, %s625_s29, 63 }
 0x1e2   :  { %s633_s26 = scalar_lea.smem [#allocation2], %s632_s17 }
 0x1e4   :  { %s593_s4 = smul.f32 0.7, %s1047_s15 }
 0x1e5   :  { %p642_p7 = scmp.gt.s32.totalorder %s1703_s14, 0  ;;  %p654_p8 = scmp.gt.s32.totalorder %s1703_s14, 1 }
 0x1e6   :  { %s1685_s16 = sadd.f32 %s593_s4, %s591_s8  ;;  %p666_p9 = scmp.gt.s32.totalorder %s1703_s14, 2 }
 0x1e7   :  { %s636_s4 = scalar_select %p631_p6, 1, 0 }
 0x1e8   :  { %598 = sst [smem:[%s597_s24]] %s1685_s16  ;;  %s1988_s16 = smov (!%p595_p3, %s1685_s16), %s1986_s7 }
 0x1e9   :  { %s1049_s30 = sld [smem:[#allocation2 + $0x4]]  ;;  %s637_s20 = sadd.s32 %s636_s4, %s625_s29 }
 0x1ea   :  { %s627_s24 = smul.f32 0.3, %s1052_s3  ;;  %s1056_s7 = sld [smem:[#allocation3 + $0x31]] }
 0x1eb   :  { %s647_s0 = scalar_select %p642_p7, 1, 0 }
 0x1ec   :  { %s659_s12 = scalar_select %p654_p8, 1, 0 }
 0x1ed   :  { %s648_s28 = sadd.s32 %s647_s0, %s637_s20  ;;  %s1059_s4 = sld [smem:[#allocation3 + $0x33]] }
 0x1ee   :  { %s655_s22 = scalar_select %p654_p8, %s648_s28, 63 }
 0x1ef   :  { %s605_s1 = smul.f32 0.7, %s1049_s30  ;;  %p678_p10 = scmp.gt.s32.totalorder %s1703_s14, 3 }
 0x1f0   :  { %s643_s30 = scalar_select %p642_p7, %s637_s20, 63 }
 0x1f1   :  { %s606_s27 = sadd.f32 %s605_s1, %s603_s11  ;;  %p690_p11 = scmp.gt.s32.totalorder %s1703_s14, 4 }
 0x1f2   :  { %s671_s3 = scalar_select %p666_p9, 1, 0 }
 0x1f3   :  { %610 = sst [smem:[%s609_s6]] %s606_s27  ;;  %s1990_s27 = smov (!%p607_p4, %s606_s27), %s1988_s16 }
 0x1f4   :  { %s1051_s2 = sld [smem:[#allocation2 + $0x5]]  ;;  %s644_s16 = scalar_lea.smem [#allocation2], %s643_s30 }
 0x1f5   :  { %s1057_s6 = sld [smem:[#allocation3 + $0x32]]  ;;  %s674_s30 = smul.f32 0.3, %s1059_s4 }
 0x1f6   :  { %s841_s0 = sld [smem:[#allocation8]]  ;;  %p702_p12 = scmp.gt.s32.totalorder %s1703_s14, 5 }
 0x1f7   :  { %p714_p13 = scmp.gt.s32.totalorder %s1703_s14, 6  ;;  %p726_p0 = scmp.gt.s32.totalorder %s1703_s14, 7 }
 0x1fa   :  { %s617_s15 = smul.f32 0.7, %s1051_s2  ;;  %s656_s2 = scalar_lea.smem [#allocation2], %s655_s22 }
 0x1fc   :  { %s618_s8 = sadd.f32 %s617_s15, %s615_s19  ;;  %s660_s19 = sadd.s32 %s659_s12, %s648_s28  ;;  %v842_v13 = vstv %s841_s0 }
 0x1fd   :  { %s667_s17 = scalar_select %p666_p9, %s660_s19, 63  ;;  %v843_v16 = vadd.f32 %v842_v13, %v840_v12 }
 0x1fe   :  { %622 = sst [smem:[%s621_s5]] %s618_s8  ;;  %s1992_s8 = smov (!%p619_p5, %s618_s8), %s1990_s27 }
 0x1ff   :  { %s1053_s23 = sld [smem:[#allocation2 + $0x6]]  ;;  %s650_s27 = smul.f32 0.3, %s1056_s7  ;;  %v844_v22 = vmax.f32 %v843_v16, 0.0 }
 0x200   :  { %s662_s15 = smul.f32 0.3, %s1057_s6  ;;  %s672_s20 = sadd.s32 %s671_s3, %s660_s19 }
 0x201   :  { %s1086_s7 = sld [smem:[#allocation8 + $0x1]] }
 0x202   :  { %s1088_s28 = sld [smem:[#allocation8 + $0x2]] }
 0x203   :  { %s695_s19 = scalar_select %p690_p11, 1, 0 }
 0x204   :  { %s1070_s3 = sld [smem:[#allocation3 + $0x38]] }
 0x205   :  { %s629_s11 = smul.f32 0.7, %s1053_s23  ;;  %s668_s23 = scalar_lea.smem [#allocation2], %s667_s17 }
 0x207   :  { %s630_s18 = sadd.f32 %s629_s11, %s627_s24  ;;  %v857_v14 = vstv %s1086_s7 }
 0x208   :  { %s683_s11 = scalar_select %p678_p10, 1, 0  ;;  %v858_v17 = vadd.f32 %v857_v14, %v855_v10  ;;  %v872_v19 = vstv %s1088_s28 }
 0x209   :  { %634 = sst [smem:[%s633_s26]] %s630_s18  ;;  %s1994_s18 = smov (!%p631_p6, %s630_s18), %s1992_s8  ;;  %v873_v21 = vadd.f32 %v872_v19, %v870_v15 }
 0x20a   :  { %645 = sst [smem:[%s644_s16]] %s1055_s13  ;;  %s1996_s13 = smov (!%p642_p7, %s1055_s13), 0.0  ;;  %v859_v20 = vmax.f32 %v858_v17, 0.0 }
 0x20b   :  { %639 = sst [smem:[#allocation9 + $0x5]] %s1994_s18  ;;  %s684_s22 = sadd.s32 %s683_s11, %s672_s20  ;;  %v874_v23 = vmax.f32 %v873_v21, 0.0 }
 0x20c   :  { %s651_s1 = sld [smem:[#allocation2]] }
 0x20d   :  { %s1750_s26 = sld [smem:[#allocation3 + $0x34]]  ;;  %v879_v24 = vsel %vm878_vm1, %v859_v20, %v874_v23 }
 0x20e   :  { %v880_v25 = vsel %vm877_vm2, %v844_v22, %v879_v24  ;;  %s719_s11 = scalar_select %p714_p13, 1, 0 }
 0x20f   :  { %882 = vst.msk [vmem:[%s1878_s10] sm:$0xff] %vm881_vm3, %v880_v25 }
 0x212   :  { %s652_s25 = smul.f32 0.7, %s651_s1 }
 0x213   :  { %s686_s6 = smul.f32 0.3, %s1750_s26 }
 0x214   :  { %s653_s21 = sadd.f32 %s652_s25, %s650_s27 }
 0x215   :  { %s691_s25 = scalar_select %p690_p11, %s684_s22, 63 }
 0x216   :  { %657 = sst [smem:[%s656_s2]] %s653_s21  ;;  %s1998_s21 = smov (!%p654_p8, %s653_s21), %s1996_s13 }
 0x217   :  { %s1058_s29 = sld [smem:[#allocation2 + $0x1]]  ;;  %s692_s17 = scalar_lea.smem [#allocation2], %s691_s25 }
 0x218   :  { %s679_s13 = scalar_select %p678_p10, %s672_s20, 63 }
 0x219   :  { %s1063_s2 = sld [smem:[#allocation3 + $0x35]] }
 0x21a   :  { %s680_s1 = scalar_lea.smem [#allocation2], %s679_s13  ;;  %s1065_s13 = sld [smem:[#allocation3 + $0x36]] }
 0x21d   :  { %s664_s8 = smul.f32 0.7, %s1058_s29 }
 0x21f   :  { %s1742_s5 = sadd.f32 %s664_s8, %s662_s15  ;;  %s696_s8 = sadd.s32 %s695_s19, %s684_s22 }
 0x220   :  { %s703_s20 = scalar_select %p702_p12, %s696_s8, 63 }
 0x221   :  { %669 = sst [smem:[%s668_s23]] %s1742_s5  ;;  %s698_s23 = smul.f32 0.3, %s1063_s2 }
 0x222   :  { %s1060_s24 = sld [smem:[#allocation2 + $0x2]]  ;;  %s710_s28 = smul.f32 0.3, %s1065_s13 }
 0x223   :  { %s2000_s5 = smov (!%p666_p9, %s1742_s5), %s1998_s21  ;;  %s1782_s22 = sld [smem:[#allocation6 + $0x7]] }
 0x224   :  { %s731_s2 = scalar_select %p726_p0, 1, 0 }
 0x228   :  { %s676_s18 = smul.f32 0.7, %s1060_s24 }
 0x229   :  { %s707_s24 = scalar_select %p702_p12, 1, 0 }
 0x22a   :  { %s1752_s16 = sadd.f32 %s676_s18, %s674_s30  ;;  %s704_s18 = scalar_lea.smem [#allocation2], %s703_s20 }
 0x22b   :  { %s708_s10 = sadd.s32 %s707_s24, %s696_s8  ;;  %p737_p1 = scmp.gt.s32.totalorder %s1782_s22, 0 }
 0x22c   :  { %681 = sst [smem:[%s680_s1]] %s1752_s16  ;;  %s720_s1 = sadd.s32 %s719_s11, %s708_s10 }
 0x22d   :  { %s1062_s27 = sld [smem:[#allocation2 + $0x3]]  ;;  %s2002_s16 = smov (!%p678_p10, %s1752_s16), %s2000_s5 }
 0x22e   :  { %s715_s7 = scalar_select %p714_p13, %s708_s10, 63 }
 0x22f   :  { %s742_s5 = scalar_select %p737_p1, 1, 0 }
 0x230   :  { %s716_s19 = scalar_lea.smem [#allocation2], %s715_s7  ;;  %p749_p2 = scmp.gt.s32.totalorder %s1782_s22, 1 }
 0x231   :  { %s1072_s11 = sld [smem:[#allocation3 + $0x3a]]  ;;  %p761_p3 = scmp.gt.s32.totalorder %s1782_s22, 2 }
 0x232   :  { %p773_p4 = scmp.gt.s32.totalorder %s1782_s22, 3  ;;  %p785_p5 = scmp.gt.s32.totalorder %s1782_s22, 4 }
 0x233   :  { %s688_s12 = smul.f32 0.7, %s1062_s27  ;;  %p797_p6 = scmp.gt.s32.totalorder %s1782_s22, 5 }
 0x234   :  { %s727_s27 = scalar_select %p726_p0, %s720_s1, 63 }
 0x235   :  { %s1761_s29 = sadd.f32 %s688_s12, %s686_s6  ;;  %p809_p7 = scmp.gt.s32.totalorder %s1782_s22, 6 }
 0x236   :  { %s1067_s6 = sld [smem:[#allocation3 + $0x37]]  ;;  %s728_s20 = scalar_lea.smem [#allocation2], %s727_s27 }
 0x237   :  { %693 = sst [smem:[%s692_s17]] %s1761_s29  ;;  %s2004_s29 = smov (!%p690_p11, %s1761_s29), %s2002_s16 }
 0x238   :  { %s1064_s4 = sld [smem:[#allocation2 + $0x4]]  ;;  %s732_s17 = sadd.s32 %s731_s2, %s720_s1 }
 0x239   :  { %s738_s8 = scalar_select %p737_p1, %s732_s17, 63 }
 0x23a   :  { %s1071_s16 = sld [smem:[#allocation3 + $0x39]]  ;;  %s743_s24 = sadd.s32 %s742_s5, %s732_s17 }
 0x23b   :  { %s757_s27 = smul.f32 0.3, %s1072_s11  ;;  %p821_p8 = scmp.gt.s32.totalorder %s1782_s22, 7 }
 0x23c   :  { %s722_s15 = smul.f32 0.3, %s1067_s6 }
 0x23e   :  { %s700_s30 = smul.f32 0.7, %s1064_s4 }
 0x240   :  { %s701_s0 = sadd.f32 %s700_s30, %s698_s23 }
 0x241   :  { %s750_s30 = scalar_select %p749_p2, %s743_s24, 63 }
 0x242   :  { %705 = sst [smem:[%s704_s18]] %s701_s0  ;;  %s2006_s0 = smov (!%p702_p12, %s701_s0), %s2004_s29 }
 0x243   :  { %s1066_s26 = sld [smem:[#allocation2 + $0x5]]  ;;  %s739_s29 = scalar_lea.smem [#allocation2], %s738_s8 }
 0x244   :  { %s754_s18 = scalar_select %p749_p2, 1, 0 }
 0x245   :  { %s751_s7 = scalar_lea.smem [#allocation2], %s750_s30 }
 0x246   :  { %s778_s8 = scalar_select %p773_p4, 1, 0 }
 0x247   :  { %s790_s30 = scalar_select %p785_p5, 1, 0 }
 0x249   :  { %s712_s25 = smul.f32 0.7, %s1066_s26  ;;  %s755_s26 = sadd.s32 %s754_s18, %s743_s24 }
 0x24a   :  { %s762_s1 = scalar_select %p761_p3, %s755_s26, 63 }
 0x24b   :  { %s713_s12 = sadd.f32 %s712_s25, %s710_s28 }
 0x24c   :  { %s766_s25 = scalar_select %p761_p3, 1, 0 }
 0x24d   :  { %717 = sst [smem:[%s716_s19]] %s713_s12  ;;  %s2008_s12 = smov (!%p714_p13, %s713_s12), %s2006_s0 }
 0x24e   :  { %s1068_s21 = sld [smem:[#allocation2 + $0x6]]  ;;  %s745_s0 = smul.f32 0.3, %s1071_s16 }
 0x24f   :  { %s763_s19 = scalar_lea.smem [#allocation2], %s762_s1 }
 0x254   :  { %s724_s4 = smul.f32 0.7, %s1068_s21  ;;  %s767_s21 = sadd.s32 %s766_s25, %s755_s26 }
 0x256   :  { %s725_s23 = sadd.f32 %s724_s4, %s722_s15 }
 0x257   :  { %s774_s15 = scalar_select %p773_p4, %s767_s21, 63 }
 0x258   :  { %729 = sst [smem:[%s728_s20]] %s725_s23  ;;  %s2010_s23 = smov (!%p726_p0, %s725_s23), %s2008_s12 }
 0x259   :  { %740 = sst [smem:[%s739_s29]] %s1070_s3  ;;  %s2012_s3 = smov (!%p737_p1, %s1070_s3), 0.0 }
 0x25a   :  { %734 = sst [smem:[#allocation9 + $0x6]] %s2010_s23  ;;  %s775_s16 = scalar_lea.smem [#allocation2], %s774_s15 }
 0x25b   :  { %s746_s13 = sld [smem:[#allocation2]]  ;;  %s779_s20 = sadd.s32 %s778_s8, %s767_s21 }
 0x25c   :  { %s1074_s12 = sld [smem:[#allocation3 + $0x3b]] }
 0x25d   :  { %s1076_s4 = sld [smem:[#allocation3 + $0x3c]] }
 0x25e   :  { %s786_s24 = scalar_select %p785_p5, %s779_s20, 63 }
 0x25f   :  { %s814_s8 = scalar_select %p809_p7, 1, 0 }
 0x260   :  { %s787_s18 = scalar_lea.smem [#allocation2], %s786_s24 }
 0x261   :  { %s747_s10 = smul.f32 0.7, %s746_s13 }
 0x263   :  { %s748_s14 = sadd.f32 %s747_s10, %s745_s0  ;;  %s781_s13 = smul.f32 0.3, %s1076_s4 }
 0x264   :  { %s1078_s10 = sld [smem:[#allocation3 + $0x3d]] }
 0x265   :  { %752 = sst [smem:[%s751_s7]] %s748_s14  ;;  %s2014_s14 = smov (!%p749_p2, %s748_s14), %s2012_s3 }
 0x266   :  { %s1073_s28 = sld [smem:[#allocation2 + $0x1]]  ;;  %s769_s3 = smul.f32 0.3, %s1074_s12 }
 0x267   :  { %s791_s7 = sadd.s32 %s790_s30, %s779_s20  ;;  %s1082_s4 = sld [smem:[#allocation3 + $0x3f]] }
 0x26a   :  { %s793_s1 = smul.f32 0.3, %s1078_s10 }
 0x26c   :  { %s759_s6 = smul.f32 0.7, %s1073_s28 }
 0x26d   :  { %s798_s28 = scalar_select %p797_p6, %s791_s7, 63 }
 0x26e   :  { %s1821_s2 = sadd.f32 %s759_s6, %s757_s27 }
 0x26f   :  { %s802_s27 = scalar_select %p797_p6, 1, 0 }
 0x270   :  { %764 = sst [smem:[%s763_s19]] %s1821_s2  ;;  %s799_s21 = scalar_lea.smem [#allocation2], %s798_s28 }
 0x271   :  { %s1075_s17 = sld [smem:[#allocation2 + $0x2]]  ;;  %s803_s19 = sadd.s32 %s802_s27, %s791_s7 }
 0x272   :  { %s1080_s6 = sld [smem:[#allocation3 + $0x3e]]  ;;  %s2016_s2 = smov (!%p761_p3, %s1821_s2), %s2014_s14 }
 0x273   :  { %s815_s20 = sadd.s32 %s814_s8, %s803_s19  ;;  %s817_s14 = smul.f32 0.3, %s1082_s4 }
 0x274   :  { %s2022_s20 = smov (!%p821_p8, %s815_s20), 63 }
 0x277   :  { %s771_s5 = smul.f32 0.7, %s1075_s17 }
 0x278   :  { %s810_s17 = scalar_select %p809_p7, %s803_s19, 63 }
 0x279   :  { %s1829_s23 = sadd.f32 %s771_s5, %s769_s3  ;;  %s805_s3 = smul.f32 0.3, %s1080_s6 }
 0x27b   :  { %776 = sst [smem:[%s775_s16]] %s1829_s23  ;;  %s2018_s23 = smov (!%p773_p4, %s1829_s23), %s2016_s2 }
 0x27c   :  { %s1077_s29 = sld [smem:[#allocation2 + $0x3]]  ;;  %s1146_s2 = smov [#allocation9]  }
 0x282   :  { %s783_s0 = smul.f32 0.7, %s1077_s29  ;;  %s811_s29 = scalar_lea.smem [#allocation2], %s810_s17 }
 0x284   :  { %s1837_s11 = sadd.f32 %s783_s0, %s781_s13  ;;  %s823_s0 = scalar_lea.smem [#allocation2], %s2022_s20 }
 0x286   :  { %788 = sst [smem:[%s787_s18]] %s1837_s11  ;;  %s2020_s11 = smov (!%p785_p5, %s1837_s11), %s2018_s23 }
 0x287   :  { %s1079_s26 = sld [smem:[#allocation2 + $0x4]] }
 0x28d   :  { %s795_s25 = smul.f32 0.7, %s1079_s26 }
 0x28f   :  { %s796_s12 = sadd.f32 %s795_s25, %s793_s1 }
 0x291   :  { %800 = sst [smem:[%s799_s21]] %s796_s12  ;;  %s2024_s12 = smov (!%p797_p6, %s796_s12), %s2020_s11 }
 0x292   :  { %s1081_s15 = sld [smem:[#allocation2 + $0x5]] }
 0x298   :  { %s807_s5 = smul.f32 0.7, %s1081_s15 }
 0x29a   :  { %s808_s16 = sadd.f32 %s807_s5, %s805_s3 }
 0x29c   :  { %812 = sst [smem:[%s811_s29]] %s808_s16  ;;  %s2026_s16 = smov (!%p809_p7, %s808_s16), %s2024_s12 }
 0x29d   :  { %s1083_s24 = sld [smem:[#allocation2 + $0x6]] }
 0x2a3   :  { %s819_s13 = smul.f32 0.7, %s1083_s24 }
 0x2a5   :  { %s820_s30 = sadd.f32 %s819_s13, %s817_s14 }
 0x2a7   :  { %824 = sst [smem:[%s823_s0]] %s820_s30  ;;  %s2028_s30 = smov (!%p821_p8, %s820_s30), %s2026_s16 }
 0x2a8   :  { %827 = sst [smem:[#allocation9 + $0x7]] %s2028_s30 }
 0x2a9   :  { %890 = dma.smem_to_hbm %s1146_s2, 16, %s1877_s9, [#allocation4]  }
 0x2aa   :  { %1141 = dma.done.wait [#allocation4], 16  }
 0x2ab   :  { %1142 = vsyncadd [#allocation4], 4294967280 }
 0x2ac   :  { %898 = sfence }
 0x2ad   :  { %899 = vsyncpa [#allocation4], 1 }
 0x2ae   :  { %900 = vsyncpa [#allocation5], 1 }
 0x2af   :  { %901 = vsyncpa [#allocation7], 1 }

</bundles_post_ra>
